<compile_context>
chip_gen: v7x
topology: tpu7x:2x2x1
jax: 0.10.0
libtpu: 0.0.40
codegen_flags: <defaults>
</compile_context>

<pallas_src>
import functools

import jax
import jax.numpy as jnp
from jax.experimental import pallas as pl


LANE = 128  # TPU lane width; fused head output is padded to a multiple of this.


# ----------------------------------------------------------------------------
# Fused Pallas kernel: encoder (Linear+ReLU) -> LSTM recurrence -> actor/critic head
# ----------------------------------------------------------------------------
def _fused_policy_kernel(x_ref, enc_w_ref, enc_b_ref, w_ih_t_ref, w_hh_t_ref,
                         b_lstm_ref, head_w_ref, head_b_ref, h0_ref, c0_ref,
                         out_ref, hfin_ref, cfin_ref, *, B, TT, H):
    """Shapes:
      x_ref      : (TT*B, obs_dim) bf16  time-major flattened observations
      enc_w_ref  : (obs_dim, I)    bf16
      enc_b_ref  : (1, I)          f32
      w_ih_t_ref : (I, 4H)         bf16  W_ih^T, gates packed [i, f, o, g]
      w_hh_t_ref : (H, 4H)         bf16  W_hh^T, gates packed [i, f, o, g]
      b_lstm_ref : (1, 4H)         f32   b_ih + b_hh, gates packed [i, f, o, g]
      head_w_ref : (H, P)          bf16  [actor | critic | zero pad], P multiple of 128
      head_b_ref : (1, P)          f32
      h0/c0      : (B, H)          f32
      out_ref    : (TT*B, P)       f32   time-major fused head output
      hfin/cfin  : (B, H)          f32   final LSTM state
    """
    # ---- encoder: one matmul over the whole (TT*B) batch ----
    enc = jnp.dot(x_ref[...], enc_w_ref[...], preferred_element_type=jnp.float32)
    enc = jnp.maximum(enc + enc_b_ref[...], 0.0)                    # (TT*B, I) f32

    # ---- input-gate contribution for ALL timesteps, bias folded in (one M=TT*B matmul) ----
    gates_x = jnp.dot(enc.astype(jnp.bfloat16), w_ih_t_ref[...],
                      preferred_element_type=jnp.float32) + b_lstm_ref[...]   # (TT*B, 4H)
    gates_x = gates_x.reshape(TT, B, 4 * H)                         # time-major, free reshape

    w_hh_t = w_hh_t_ref[...]                                        # hoisted weight read

    h = h0_ref[...]                                                 # (B, H) f32
    c = c0_ref[...]
    hs = []

    # ---- LSTM recurrence: only h @ W_hh^T + gate math left on the serial chain ----
    # TT is a small static constant -> full unroll keeps the chain visible to the scheduler.
    # TODO(synk): switch to lax.fori_loop(..., unroll=4-8) + VMEM scratch if TT grows >~32.
    for t in range(TT):
        gates = gates_x[t] + jnp.dot(h.astype(jnp.bfloat16), w_hh_t,
                                     preferred_element_type=jnp.float32)      # (B, 4H) f32
        sig = jax.nn.sigmoid(gates[:, :3 * H])                      # packed sigmoids [i, f, o]
        i_g = sig[:, 0 * H:1 * H]
        f_g = sig[:, 1 * H:2 * H]
        o_g = sig[:, 2 * H:3 * H]
        g_g = jnp.tanh(gates[:, 3 * H:])
        c = f_g * c + i_g * g_g
        h = o_g * jnp.tanh(c)
        hs.append(h)

    # ---- hoisted actor/critic head: ONE (TT*B, H) @ (H, P) matmul + lane-dense store ----
    h_all = jnp.concatenate(hs, axis=0)                             # (TT*B, H) time-major
    out = jnp.dot(h_all.astype(jnp.bfloat16), head_w_ref[...],
                  preferred_element_type=jnp.float32) + head_b_ref[...]
    out_ref[...] = out.astype(out_ref.dtype)

    hfin_ref[...] = h.astype(hfin_ref.dtype)
    cfin_ref[...] = c.astype(cfin_ref.dtype)


# ----------------------------------------------------------------------------
# Parameter init (deterministic, PyTorch convention) + one-time packing
# ----------------------------------------------------------------------------
def _orthogonal(key, shape):
    """Equivalent of nn.init.orthogonal_(param, 1.0) for a 2D matrix."""
    rows, cols = shape
    flip = rows < cols
    a = jax.random.normal(key, (max(rows, cols), min(rows, cols)), jnp.float32)
    q, r = jnp.linalg.qr(a)
    sign = jnp.sign(jnp.diagonal(r))
    sign = jnp.where(sign == 0, 1.0, sign)
    q = q * sign[None, :]
    return (q.T if flip else q).astype(jnp.float32)


def init_params(key, obs_dim, input_size, hidden_size, num_actions):
    """PyTorch-convention parameters (mirrors RecurrentWrapper.__init__)."""
    ks = jax.random.split(key, 6)
    return {
        # policy.encode_observations: Linear(obs_dim -> input_size) + ReLU
        "enc_w": _orthogonal(ks[0], (obs_dim, input_size)),
        "enc_b": jnp.zeros((input_size,), jnp.float32),
        # nn.LSTM: weight_* = (4H, in), gate order [i, f, g, o]; biases zero at init
        "w_ih": _orthogonal(ks[1], (4 * hidden_size, input_size)),
        "w_hh": _orthogonal(ks[2], (4 * hidden_size, hidden_size)),
        "b_ih": jnp.zeros((4 * hidden_size,), jnp.float32),
        "b_hh": jnp.zeros((4 * hidden_size,), jnp.float32),
        # policy.decode_actions: actor + critic heads
        "actor_w": _orthogonal(ks[3], (hidden_size, num_actions)),
        "actor_b": jnp.zeros((num_actions,), jnp.float32),
        "critic_w": _orthogonal(ks[4], (hidden_size, 1)),
        "critic_b": jnp.zeros((1,), jnp.float32),
    }


def pack_params(params, hidden_size):
    """One-time repack into the fused-kernel layout.  Call at init, NOT per forward."""
    H = hidden_size
    A = params["actor_w"].shape[1]

    # Reorder PyTorch gate blocks [i, f, g, o] -> [i, f, o, g] (sigmoid gates contiguous).
    def reorder_rows(w):                                  # w: (4H, K)
        w4 = w.reshape(4, H, -1)
        return jnp.concatenate([w4[0], w4[1], w4[3], w4[2]], axis=0)

    w_ih = reorder_rows(params["w_ih"])                   # (4H, I)
    w_hh = reorder_rows(params["w_hh"])                   # (4H, H)
    b = params["b_ih"] + params["b_hh"]                   # PyTorch has two biases: sum them
    b4 = b.reshape(4, H)
    b_lstm = jnp.concatenate([b4[0], b4[1], b4[3], b4[2]], axis=0)

    # Fused actor|critic head, zero-padded to a lane-dense width P (multiple of 128).
    P = ((A + 1 + LANE - 1) // LANE) * LANE
    head_w = jnp.zeros((H, P), jnp.float32)
    head_w = head_w.at[:, :A].set(params["actor_w"])
    head_w = head_w.at[:, A:A + 1].set(params["critic_w"])
    head_b = jnp.zeros((P,), jnp.float32)
    head_b = head_b.at[:A].set(params["actor_b"])
    head_b = head_b.at[A:A + 1].set(params["critic_b"])

    return {
        "enc_w": params["enc_w"].astype(jnp.bfloat16),
        "enc_b": params["enc_b"].reshape(1, -1).astype(jnp.float32),
        "w_ih_t": w_ih.T.astype(jnp.bfloat16),            # (I, 4H)
        "w_hh_t": w_hh.T.astype(jnp.bfloat16),            # (H, 4H)
        "b_lstm": b_lstm.reshape(1, 4 * H).astype(jnp.float32),
        "head_w": head_w.astype(jnp.bfloat16),
        "head_b": head_b.reshape(1, P).astype(jnp.float32),
    }


# ----------------------------------------------------------------------------
# RecurrentWrapper.forward (takes the pre-packed params)
# ----------------------------------------------------------------------------
def recurrent_wrapper_forward(packed, x, state, *, hidden_size, num_actions):
    """x: (B, TT, obs_dim) or (B, obs_dim). state: (h0, c0) each (1, B, H) or None."""
    if x.ndim == 2:
        B, TT = x.shape[0], 1
        obs_dim = x.shape[-1]
        x3 = x[:, None, :]
    elif x.ndim == 3:
        B, TT = x.shape[:2]
        obs_dim = x.shape[-1]
        x3 = x
    else:
        raise ValueError("Invalid input tensor shape", x.shape)

    H = hidden_size
    A = num_actions
    P = packed["head_w"].shape[1]

    if state is None:
        h0 = jnp.zeros((B, H), jnp.float32)
        c0 = jnp.zeros((B, H), jnp.float32)
    else:
        h0 = state[0].reshape(B, H).astype(jnp.float32)
        c0 = state[1].reshape(B, H).astype(jnp.float32)

    # (B, TT, obs) -> time-major flattened (TT*B, obs), bf16 (tiny reorder, halves input DMA).
    x_tm = x3.transpose(1, 0, 2).reshape(TT * B, obs_dim).astype(jnp.bfloat16)

    out_tm, h_n, c_n = pl.pallas_call(
        functools.partial(_fused_policy_kernel, B=B, TT=TT, H=H),
        out_shape=(
            jax.ShapeDtypeStruct((TT * B, P), jnp.float32),
            jax.ShapeDtypeStruct((B, H), jnp.float32),
            jax.ShapeDtypeStruct((B, H), jnp.float32),
        ),
    )(x_tm, packed["enc_w"], packed["enc_b"], packed["w_ih_t"], packed["w_hh_t"],
      packed["b_lstm"], packed["head_w"], packed["head_b"], h0, c0)

    # time-major (TT*B, P) -> batch-major (B*TT, P); this transpose + reshape + the two
    # slices below are tiny (32 KB) and fuse into one XLA copy.
    out_bm = out_tm.reshape(TT, B, P).transpose(1, 0, 2).reshape(B * TT, P)
    actions = out_bm[:, :A]
    critic = out_bm[:, A:A + 1]

    state_out = (h_n.reshape(1, B, H), c_n.reshape(1, B, H))
    return actions, critic, state_out


# ----------------------------------------------------------------------------
# Pure-JAX f32 reference (mirrors the PyTorch module exactly)
# ----------------------------------------------------------------------------
def reference_forward(params, x3, state, *, hidden_size):
    B, TT, obs_dim = x3.shape
    H = hidden_size
    x_flat = x3.reshape(B * TT, obs_dim)
    enc = jnp.maximum(x_flat @ params["enc_w"] + params["enc_b"], 0.0)   # (B*TT, I)
    enc = enc.reshape(B, TT, -1).transpose(1, 0, 2)                      # (TT, B, I)

    if state is None:
        h = jnp.zeros((B, H), jnp.float32)
        c = jnp.zeros((B, H), jnp.float32)
    else:
        h = state[0].reshape(B, H)
        c = state[1].reshape(B, H)

    w_ih, w_hh = params["w_ih"], params["w_hh"]
    b = params["b_ih"] + params["b_hh"]
    outs = []
    for t in range(TT):
        g = enc[t] @ w_ih.T + h @ w_hh.T + b                 # PyTorch gate order [i, f, g, o]
        i_g = jax.nn.sigmoid(g[:, 0 * H:1 * H])
        f_g = jax.nn.sigmoid(g[:, 1 * H:2 * H])
        g_g = jnp.tanh(g[:, 2 * H:3 * H])
        o_g = jax.nn.sigmoid(g[:, 3 * H:4 * H])
        c = f_g * c + i_g * g_g
        h = o_g * jnp.tanh(c)
        outs.append(h)
    hid = jnp.stack(outs, axis=0).transpose(1, 0, 2).reshape(B * TT, H)
    actions = hid @ params["actor_w"] + params["actor_b"]
    value = hid @ params["critic_w"] + params["critic_b"]
    return actions, value, (h.reshape(1, B, H), c.reshape(1, B, H))


# ----------------------------------------------------------------------------
# main
# ----------------------------------------------------------------------------
if __name__ == "__main__":
    B, TT = 8, 8
    OBS_DIM = 16
    INPUT_SIZE = 128
    HIDDEN_SIZE = 128
    NUM_ACTIONS = 6

    key = jax.random.PRNGKey(0)
    k_param, k_x = jax.random.split(key)

    params = init_params(k_param, OBS_DIM, INPUT_SIZE, HIDDEN_SIZE, NUM_ACTIONS)
    packed = pack_params(params, HIDDEN_SIZE)      # packed ONCE, outside the hot path
    x = jax.random.normal(k_x, (B, TT, OBS_DIM), jnp.float32)

    fwd = jax.jit(functools.partial(recurrent_wrapper_forward,
                                    hidden_size=HIDDEN_SIZE, num_actions=NUM_ACTIONS))
    actions, value, state = fwd(packed, x, None)

    actions = jax.block_until_ready(actions)
    value = jax.block_until_ready(value)
    state = jax.block_until_ready(state)

    # Shape / sanity checks.
    assert actions.shape == (B * TT, NUM_ACTIONS)
    assert value.shape == (B * TT, 1)
    assert state[0].shape == (1, B, HIDDEN_SIZE)
    assert state[1].shape == (1, B, HIDDEN_SIZE)
    assert bool(jnp.isfinite(actions).all()) and bool(jnp.isfinite(value).all())
    assert bool(jnp.isfinite(state[0]).all()) and bool(jnp.isfinite(state[1]).all())

    # Tolerance-checked f32 reference (bf16 matmul operands -> loose-ish tolerance).
    ref_a, ref_v, ref_s = reference_forward(params, x, None, hidden_size=HIDDEN_SIZE)
    tol = dict(rtol=5e-2, atol=5e-2)
    assert bool(jnp.allclose(actions, ref_a, **tol)), "actor logits mismatch vs reference"
    assert bool(jnp.allclose(value, ref_v, **tol)), "critic value mismatch vs reference"
    assert bool(jnp.allclose(state[0], ref_s[0], **tol)), "h_n mismatch vs reference"
    assert bool(jnp.allclose(state[1], ref_s[1], **tol)), "c_n mismatch vs reference"

    print("KERNEL_OK")
</pallas_src>

<mosaic_0001>
module attributes {stable_mosaic.version = 11 : i64} {
  func.func @_fused_policy_kernel(%arg0: memref<64x16xbf16, #tpu.memory_space<vmem>>, %arg1: memref<16x128xbf16, #tpu.memory_space<vmem>>, %arg2: memref<1x128xf32, #tpu.memory_space<vmem>>, %arg3: memref<128x512xbf16, #tpu.memory_space<vmem>>, %arg4: memref<128x512xbf16, #tpu.memory_space<vmem>>, %arg5: memref<1x512xf32, #tpu.memory_space<vmem>>, %arg6: memref<128x128xbf16, #tpu.memory_space<vmem>>, %arg7: memref<1x128xf32, #tpu.memory_space<vmem>>, %arg8: memref<8x128xf32, #tpu.memory_space<vmem>>, %arg9: memref<8x128xf32, #tpu.memory_space<vmem>>, %arg10: memref<64x128xf32, #tpu.memory_space<vmem>>, %arg11: memref<8x128xf32, #tpu.memory_space<vmem>>, %arg12: memref<8x128xf32, #tpu.memory_space<vmem>>) attributes {dimension_semantics = [], scalar_prefetch = 0 : i64, scratch_operands = 0 : i64, tpu.core_type = #tpu.core_type<tc>} {
    %c0 = arith.constant 0 : index
    %c0_0 = arith.constant 0 : index
    %0 = vector.load %arg0[%c0, %c0_0] : memref<64x16xbf16, #tpu.memory_space<vmem>>, vector<64x16xbf16>
    %c0_1 = arith.constant 0 : index
    %c0_2 = arith.constant 0 : index
    %1 = vector.load %arg1[%c0_1, %c0_2] : memref<16x128xbf16, #tpu.memory_space<vmem>>, vector<16x128xbf16>
    %cst = arith.constant dense<0.000000e+00> : vector<64x128xf32>
    %2 = tpu.matmul %0, %1, %cst {dimension_numbers = #tpu.dot_dimension_numbers<[1], [0], [0], [1], [0, 0, 1, 1], [], []>} : vector<64x16xbf16>, vector<16x128xbf16>, vector<64x128xf32> -> vector<64x128xf32>
    %c0_3 = arith.constant 0 : index
    %c0_4 = arith.constant 0 : index
    %3 = vector.load %arg2[%c0_3, %c0_4] : memref<1x128xf32, #tpu.memory_space<vmem>>, vector<1x128xf32>
    %4 = vector.broadcast %3 : vector<1x128xf32> to vector<64x128xf32>
    %5 = arith.addf %2, %4 : vector<64x128xf32>
    %cst_5 = arith.constant 0.000000e+00 : f32
    %6 = vector.broadcast %cst_5 : f32 to vector<64x128xf32>
    %7 = arith.maximumf %5, %6 : vector<64x128xf32>
    %8 = arith.truncf %7 : vector<64x128xf32> to vector<64x128xbf16>
    %c0_6 = arith.constant 0 : index
    %c0_7 = arith.constant 0 : index
    %9 = vector.load %arg3[%c0_6, %c0_7] : memref<128x512xbf16, #tpu.memory_space<vmem>>, vector<128x512xbf16>
    %cst_8 = arith.constant dense<0.000000e+00> : vector<64x512xf32>
    %10 = tpu.matmul %8, %9, %cst_8 {dimension_numbers = #tpu.dot_dimension_numbers<[1], [0], [0], [1], [0, 0, 1, 1], [], []>} : vector<64x128xbf16>, vector<128x512xbf16>, vector<64x512xf32> -> vector<64x512xf32>
    %c0_9 = arith.constant 0 : index
    %c0_10 = arith.constant 0 : index
    %11 = vector.load %arg5[%c0_9, %c0_10] : memref<1x512xf32, #tpu.memory_space<vmem>>, vector<1x512xf32>
    %12 = vector.broadcast %11 : vector<1x512xf32> to vector<64x512xf32>
    %13 = arith.addf %10, %12 : vector<64x512xf32>
    %14 = vector.shape_cast %13 : vector<64x512xf32> to vector<8x8x512xf32>
    %c0_11 = arith.constant 0 : index
    %c0_12 = arith.constant 0 : index
    %15 = vector.load %arg4[%c0_11, %c0_12] : memref<128x512xbf16, #tpu.memory_space<vmem>>, vector<128x512xbf16>
    %c0_13 = arith.constant 0 : index
    %c0_14 = arith.constant 0 : index
    %16 = vector.load %arg8[%c0_13, %c0_14] : memref<8x128xf32, #tpu.memory_space<vmem>>, vector<8x128xf32>
    %c0_15 = arith.constant 0 : index
    %c0_16 = arith.constant 0 : index
    %17 = vector.load %arg9[%c0_15, %c0_16] : memref<8x128xf32, #tpu.memory_space<vmem>>, vector<8x128xf32>
    %18 = vector.extract_strided_slice %14 {offsets = [0, 0, 0], sizes = [1, 8, 512], strides = [1, 1, 1]} : vector<8x8x512xf32> to vector<1x8x512xf32>
    %19 = vector.shape_cast %18 : vector<1x8x512xf32> to vector<8x512xf32>
    %20 = arith.truncf %16 : vector<8x128xf32> to vector<8x128xbf16>
    %cst_17 = arith.constant dense<0.000000e+00> : vector<8x512xf32>
    %21 = tpu.matmul %20, %15, %cst_17 {dimension_numbers = #tpu.dot_dimension_numbers<[1], [0], [0], [1], [0, 0, 1, 1], [], []>} : vector<8x128xbf16>, vector<128x512xbf16>, vector<8x512xf32> -> vector<8x512xf32>
    %22 = arith.addf %19, %21 : vector<8x512xf32>
    %23 = vector.extract_strided_slice %22 {offsets = [0, 0], sizes = [8, 384], strides = [1, 1]} : vector<8x512xf32> to vector<8x384xf32>
    %24 = arith.negf %23 : vector<8x384xf32>
    %25 = math.exp %24 : vector<8x384xf32>
    %cst_18 = arith.constant 1.000000e+00 : f32
    %26 = vector.broadcast %cst_18 : f32 to vector<8x384xf32>
    %27 = arith.addf %26, %25 : vector<8x384xf32>
    %28 = arith.divf %26, %27 : vector<8x384xf32>
    %29 = vector.extract_strided_slice %28 {offsets = [0, 0], sizes = [8, 128], strides = [1, 1]} : vector<8x384xf32> to vector<8x128xf32>
    %30 = vector.extract_strided_slice %28 {offsets = [0, 128], sizes = [8, 128], strides = [1, 1]} : vector<8x384xf32> to vector<8x128xf32>
    %31 = vector.extract_strided_slice %28 {offsets = [0, 256], sizes = [8, 128], strides = [1, 1]} : vector<8x384xf32> to vector<8x128xf32>
    %32 = vector.extract_strided_slice %22 {offsets = [0, 384], sizes = [8, 128], strides = [1, 1]} : vector<8x512xf32> to vector<8x128xf32>
    %33 = math.tanh %32 : vector<8x128xf32>
    %34 = arith.mulf %30, %17 : vector<8x128xf32>
    %35 = arith.mulf %29, %33 : vector<8x128xf32>
    %36 = arith.addf %34, %35 : vector<8x128xf32>
    %37 = math.tanh %36 : vector<8x128xf32>
    %38 = arith.mulf %31, %37 : vector<8x128xf32>
    %39 = vector.extract_strided_slice %14 {offsets = [1, 0, 0], sizes = [1, 8, 512], strides = [1, 1, 1]} : vector<8x8x512xf32> to vector<1x8x512xf32>
    %40 = vector.shape_cast %39 : vector<1x8x512xf32> to vector<8x512xf32>
    %41 = arith.truncf %38 : vector<8x128xf32> to vector<8x128xbf16>
    %cst_19 = arith.constant dense<0.000000e+00> : vector<8x512xf32>
    %42 = tpu.matmul %41, %15, %cst_19 {dimension_numbers = #tpu.dot_dimension_numbers<[1], [0], [0], [1], [0, 0, 1, 1], [], []>} : vector<8x128xbf16>, vector<128x512xbf16>, vector<8x512xf32> -> vector<8x512xf32>
    %43 = arith.addf %40, %42 : vector<8x512xf32>
    %44 = vector.extract_strided_slice %43 {offsets = [0, 0], sizes = [8, 384], strides = [1, 1]} : vector<8x512xf32> to vector<8x384xf32>
    %45 = arith.negf %44 : vector<8x384xf32>
    %46 = math.exp %45 : vector<8x384xf32>
    %cst_20 = arith.constant 1.000000e+00 : f32
    %47 = vector.broadcast %cst_20 : f32 to vector<8x384xf32>
    %48 = arith.addf %47, %46 : vector<8x384xf32>
    %49 = arith.divf %47, %48 : vector<8x384xf32>
    %50 = vector.extract_strided_slice %49 {offsets = [0, 0], sizes = [8, 128], strides = [1, 1]} : vector<8x384xf32> to vector<8x128xf32>
    %51 = vector.extract_strided_slice %49 {offsets = [0, 128], sizes = [8, 128], strides = [1, 1]} : vector<8x384xf32> to vector<8x128xf32>
    %52 = vector.extract_strided_slice %49 {offsets = [0, 256], sizes = [8, 128], strides = [1, 1]} : vector<8x384xf32> to vector<8x128xf32>
    %53 = vector.extract_strided_slice %43 {offsets = [0, 384], sizes = [8, 128], strides = [1, 1]} : vector<8x512xf32> to vector<8x128xf32>
    %54 = math.tanh %53 : vector<8x128xf32>
    %55 = arith.mulf %51, %36 : vector<8x128xf32>
    %56 = arith.mulf %50, %54 : vector<8x128xf32>
    %57 = arith.addf %55, %56 : vector<8x128xf32>
    %58 = math.tanh %57 : vector<8x128xf32>
    %59 = arith.mulf %52, %58 : vector<8x128xf32>
    %60 = vector.extract_strided_slice %14 {offsets = [2, 0, 0], sizes = [1, 8, 512], strides = [1, 1, 1]} : vector<8x8x512xf32> to vector<1x8x512xf32>
    %61 = vector.shape_cast %60 : vector<1x8x512xf32> to vector<8x512xf32>
    %62 = arith.truncf %59 : vector<8x128xf32> to vector<8x128xbf16>
    %cst_21 = arith.constant dense<0.000000e+00> : vector<8x512xf32>
    %63 = tpu.matmul %62, %15, %cst_21 {dimension_numbers = #tpu.dot_dimension_numbers<[1], [0], [0], [1], [0, 0, 1, 1], [], []>} : vector<8x128xbf16>, vector<128x512xbf16>, vector<8x512xf32> -> vector<8x512xf32>
    %64 = arith.addf %61, %63 : vector<8x512xf32>
    %65 = vector.extract_strided_slice %64 {offsets = [0, 0], sizes = [8, 384], strides = [1, 1]} : vector<8x512xf32> to vector<8x384xf32>
    %66 = arith.negf %65 : vector<8x384xf32>
    %67 = math.exp %66 : vector<8x384xf32>
    %cst_22 = arith.constant 1.000000e+00 : f32
    %68 = vector.broadcast %cst_22 : f32 to vector<8x384xf32>
    %69 = arith.addf %68, %67 : vector<8x384xf32>
    %70 = arith.divf %68, %69 : vector<8x384xf32>
    %71 = vector.extract_strided_slice %70 {offsets = [0, 0], sizes = [8, 128], strides = [1, 1]} : vector<8x384xf32> to vector<8x128xf32>
    %72 = vector.extract_strided_slice %70 {offsets = [0, 128], sizes = [8, 128], strides = [1, 1]} : vector<8x384xf32> to vector<8x128xf32>
    %73 = vector.extract_strided_slice %70 {offsets = [0, 256], sizes = [8, 128], strides = [1, 1]} : vector<8x384xf32> to vector<8x128xf32>
    %74 = vector.extract_strided_slice %64 {offsets = [0, 384], sizes = [8, 128], strides = [1, 1]} : vector<8x512xf32> to vector<8x128xf32>
    %75 = math.tanh %74 : vector<8x128xf32>
    %76 = arith.mulf %72, %57 : vector<8x128xf32>
    %77 = arith.mulf %71, %75 : vector<8x128xf32>
    %78 = arith.addf %76, %77 : vector<8x128xf32>
    %79 = math.tanh %78 : vector<8x128xf32>
    %80 = arith.mulf %73, %79 : vector<8x128xf32>
    %81 = vector.extract_strided_slice %14 {offsets = [3, 0, 0], sizes = [1, 8, 512], strides = [1, 1, 1]} : vector<8x8x512xf32> to vector<1x8x512xf32>
    %82 = vector.shape_cast %81 : vector<1x8x512xf32> to vector<8x512xf32>
    %83 = arith.truncf %80 : vector<8x128xf32> to vector<8x128xbf16>
    %cst_23 = arith.constant dense<0.000000e+00> : vector<8x512xf32>
    %84 = tpu.matmul %83, %15, %cst_23 {dimension_numbers = #tpu.dot_dimension_numbers<[1], [0], [0], [1], [0, 0, 1, 1], [], []>} : vector<8x128xbf16>, vector<128x512xbf16>, vector<8x512xf32> -> vector<8x512xf32>
    %85 = arith.addf %82, %84 : vector<8x512xf32>
    %86 = vector.extract_strided_slice %85 {offsets = [0, 0], sizes = [8, 384], strides = [1, 1]} : vector<8x512xf32> to vector<8x384xf32>
    %87 = arith.negf %86 : vector<8x384xf32>
    %88 = math.exp %87 : vector<8x384xf32>
    %cst_24 = arith.constant 1.000000e+00 : f32
    %89 = vector.broadcast %cst_24 : f32 to vector<8x384xf32>
    %90 = arith.addf %89, %88 : vector<8x384xf32>
    %91 = arith.divf %89, %90 : vector<8x384xf32>
    %92 = vector.extract_strided_slice %91 {offsets = [0, 0], sizes = [8, 128], strides = [1, 1]} : vector<8x384xf32> to vector<8x128xf32>
    %93 = vector.extract_strided_slice %91 {offsets = [0, 128], sizes = [8, 128], strides = [1, 1]} : vector<8x384xf32> to vector<8x128xf32>
    %94 = vector.extract_strided_slice %91 {offsets = [0, 256], sizes = [8, 128], strides = [1, 1]} : vector<8x384xf32> to vector<8x128xf32>
    %95 = vector.extract_strided_slice %85 {offsets = [0, 384], sizes = [8, 128], strides = [1, 1]} : vector<8x512xf32> to vector<8x128xf32>
    %96 = math.tanh %95 : vector<8x128xf32>
    %97 = arith.mulf %93, %78 : vector<8x128xf32>
    %98 = arith.mulf %92, %96 : vector<8x128xf32>
    %99 = arith.addf %97, %98 : vector<8x128xf32>
    %100 = math.tanh %99 : vector<8x128xf32>
    %101 = arith.mulf %94, %100 : vector<8x128xf32>
    %102 = vector.extract_strided_slice %14 {offsets = [4, 0, 0], sizes = [1, 8, 512], strides = [1, 1, 1]} : vector<8x8x512xf32> to vector<1x8x512xf32>
    %103 = vector.shape_cast %102 : vector<1x8x512xf32> to vector<8x512xf32>
    %104 = arith.truncf %101 : vector<8x128xf32> to vector<8x128xbf16>
    %cst_25 = arith.constant dense<0.000000e+00> : vector<8x512xf32>
    %105 = tpu.matmul %104, %15, %cst_25 {dimension_numbers = #tpu.dot_dimension_numbers<[1], [0], [0], [1], [0, 0, 1, 1], [], []>} : vector<8x128xbf16>, vector<128x512xbf16>, vector<8x512xf32> -> vector<8x512xf32>
    %106 = arith.addf %103, %105 : vector<8x512xf32>
    %107 = vector.extract_strided_slice %106 {offsets = [0, 0], sizes = [8, 384], strides = [1, 1]} : vector<8x512xf32> to vector<8x384xf32>
    %108 = arith.negf %107 : vector<8x384xf32>
    %109 = math.exp %108 : vector<8x384xf32>
    %cst_26 = arith.constant 1.000000e+00 : f32
    %110 = vector.broadcast %cst_26 : f32 to vector<8x384xf32>
    %111 = arith.addf %110, %109 : vector<8x384xf32>
    %112 = arith.divf %110, %111 : vector<8x384xf32>
    %113 = vector.extract_strided_slice %112 {offsets = [0, 0], sizes = [8, 128], strides = [1, 1]} : vector<8x384xf32> to vector<8x128xf32>
    %114 = vector.extract_strided_slice %112 {offsets = [0, 128], sizes = [8, 128], strides = [1, 1]} : vector<8x384xf32> to vector<8x128xf32>
    %115 = vector.extract_strided_slice %112 {offsets = [0, 256], sizes = [8, 128], strides = [1, 1]} : vector<8x384xf32> to vector<8x128xf32>
    %116 = vector.extract_strided_slice %106 {offsets = [0, 384], sizes = [8, 128], strides = [1, 1]} : vector<8x512xf32> to vector<8x128xf32>
    %117 = math.tanh %116 : vector<8x128xf32>
    %118 = arith.mulf %114, %99 : vector<8x128xf32>
    %119 = arith.mulf %113, %117 : vector<8x128xf32>
    %120 = arith.addf %118, %119 : vector<8x128xf32>
    %121 = math.tanh %120 : vector<8x128xf32>
    %122 = arith.mulf %115, %121 : vector<8x128xf32>
    %123 = vector.extract_strided_slice %14 {offsets = [5, 0, 0], sizes = [1, 8, 512], strides = [1, 1, 1]} : vector<8x8x512xf32> to vector<1x8x512xf32>
    %124 = vector.shape_cast %123 : vector<1x8x512xf32> to vector<8x512xf32>
    %125 = arith.truncf %122 : vector<8x128xf32> to vector<8x128xbf16>
    %cst_27 = arith.constant dense<0.000000e+00> : vector<8x512xf32>
    %126 = tpu.matmul %125, %15, %cst_27 {dimension_numbers = #tpu.dot_dimension_numbers<[1], [0], [0], [1], [0, 0, 1, 1], [], []>} : vector<8x128xbf16>, vector<128x512xbf16>, vector<8x512xf32> -> vector<8x512xf32>
    %127 = arith.addf %124, %126 : vector<8x512xf32>
    %128 = vector.extract_strided_slice %127 {offsets = [0, 0], sizes = [8, 384], strides = [1, 1]} : vector<8x512xf32> to vector<8x384xf32>
    %129 = arith.negf %128 : vector<8x384xf32>
    %130 = math.exp %129 : vector<8x384xf32>
    %cst_28 = arith.constant 1.000000e+00 : f32
    %131 = vector.broadcast %cst_28 : f32 to vector<8x384xf32>
    %132 = arith.addf %131, %130 : vector<8x384xf32>
    %133 = arith.divf %131, %132 : vector<8x384xf32>
    %134 = vector.extract_strided_slice %133 {offsets = [0, 0], sizes = [8, 128], strides = [1, 1]} : vector<8x384xf32> to vector<8x128xf32>
    %135 = vector.extract_strided_slice %133 {offsets = [0, 128], sizes = [8, 128], strides = [1, 1]} : vector<8x384xf32> to vector<8x128xf32>
    %136 = vector.extract_strided_slice %133 {offsets = [0, 256], sizes = [8, 128], strides = [1, 1]} : vector<8x384xf32> to vector<8x128xf32>
    %137 = vector.extract_strided_slice %127 {offsets = [0, 384], sizes = [8, 128], strides = [1, 1]} : vector<8x512xf32> to vector<8x128xf32>
    %138 = math.tanh %137 : vector<8x128xf32>
    %139 = arith.mulf %135, %120 : vector<8x128xf32>
    %140 = arith.mulf %134, %138 : vector<8x128xf32>
    %141 = arith.addf %139, %140 : vector<8x128xf32>
    %142 = math.tanh %141 : vector<8x128xf32>
    %143 = arith.mulf %136, %142 : vector<8x128xf32>
    %144 = vector.extract_strided_slice %14 {offsets = [6, 0, 0], sizes = [1, 8, 512], strides = [1, 1, 1]} : vector<8x8x512xf32> to vector<1x8x512xf32>
    %145 = vector.shape_cast %144 : vector<1x8x512xf32> to vector<8x512xf32>
    %146 = arith.truncf %143 : vector<8x128xf32> to vector<8x128xbf16>
    %cst_29 = arith.constant dense<0.000000e+00> : vector<8x512xf32>
    %147 = tpu.matmul %146, %15, %cst_29 {dimension_numbers = #tpu.dot_dimension_numbers<[1], [0], [0], [1], [0, 0, 1, 1], [], []>} : vector<8x128xbf16>, vector<128x512xbf16>, vector<8x512xf32> -> vector<8x512xf32>
    %148 = arith.addf %145, %147 : vector<8x512xf32>
    %149 = vector.extract_strided_slice %148 {offsets = [0, 0], sizes = [8, 384], strides = [1, 1]} : vector<8x512xf32> to vector<8x384xf32>
    %150 = arith.negf %149 : vector<8x384xf32>
    %151 = math.exp %150 : vector<8x384xf32>
    %cst_30 = arith.constant 1.000000e+00 : f32
    %152 = vector.broadcast %cst_30 : f32 to vector<8x384xf32>
    %153 = arith.addf %152, %151 : vector<8x384xf32>
    %154 = arith.divf %152, %153 : vector<8x384xf32>
    %155 = vector.extract_strided_slice %154 {offsets = [0, 0], sizes = [8, 128], strides = [1, 1]} : vector<8x384xf32> to vector<8x128xf32>
    %156 = vector.extract_strided_slice %154 {offsets = [0, 128], sizes = [8, 128], strides = [1, 1]} : vector<8x384xf32> to vector<8x128xf32>
    %157 = vector.extract_strided_slice %154 {offsets = [0, 256], sizes = [8, 128], strides = [1, 1]} : vector<8x384xf32> to vector<8x128xf32>
    %158 = vector.extract_strided_slice %148 {offsets = [0, 384], sizes = [8, 128], strides = [1, 1]} : vector<8x512xf32> to vector<8x128xf32>
    %159 = math.tanh %158 : vector<8x128xf32>
    %160 = arith.mulf %156, %141 : vector<8x128xf32>
    %161 = arith.mulf %155, %159 : vector<8x128xf32>
    %162 = arith.addf %160, %161 : vector<8x128xf32>
    %163 = math.tanh %162 : vector<8x128xf32>
    %164 = arith.mulf %157, %163 : vector<8x128xf32>
    %165 = vector.extract_strided_slice %14 {offsets = [7, 0, 0], sizes = [1, 8, 512], strides = [1, 1, 1]} : vector<8x8x512xf32> to vector<1x8x512xf32>
    %166 = vector.shape_cast %165 : vector<1x8x512xf32> to vector<8x512xf32>
    %167 = arith.truncf %164 : vector<8x128xf32> to vector<8x128xbf16>
    %cst_31 = arith.constant dense<0.000000e+00> : vector<8x512xf32>
    %168 = tpu.matmul %167, %15, %cst_31 {dimension_numbers = #tpu.dot_dimension_numbers<[1], [0], [0], [1], [0, 0, 1, 1], [], []>} : vector<8x128xbf16>, vector<128x512xbf16>, vector<8x512xf32> -> vector<8x512xf32>
    %169 = arith.addf %166, %168 : vector<8x512xf32>
    %170 = vector.extract_strided_slice %169 {offsets = [0, 0], sizes = [8, 384], strides = [1, 1]} : vector<8x512xf32> to vector<8x384xf32>
    %171 = arith.negf %170 : vector<8x384xf32>
    %172 = math.exp %171 : vector<8x384xf32>
    %cst_32 = arith.constant 1.000000e+00 : f32
    %173 = vector.broadcast %cst_32 : f32 to vector<8x384xf32>
    %174 = arith.addf %173, %172 : vector<8x384xf32>
    %175 = arith.divf %173, %174 : vector<8x384xf32>
    %176 = vector.extract_strided_slice %175 {offsets = [0, 0], sizes = [8, 128], strides = [1, 1]} : vector<8x384xf32> to vector<8x128xf32>
    %177 = vector.extract_strided_slice %175 {offsets = [0, 128], sizes = [8, 128], strides = [1, 1]} : vector<8x384xf32> to vector<8x128xf32>
    %178 = vector.extract_strided_slice %175 {offsets = [0, 256], sizes = [8, 128], strides = [1, 1]} : vector<8x384xf32> to vector<8x128xf32>
    %179 = vector.extract_strided_slice %169 {offsets = [0, 384], sizes = [8, 128], strides = [1, 1]} : vector<8x512xf32> to vector<8x128xf32>
    %180 = math.tanh %179 : vector<8x128xf32>
    %181 = arith.mulf %177, %162 : vector<8x128xf32>
    %182 = arith.mulf %176, %180 : vector<8x128xf32>
    %183 = arith.addf %181, %182 : vector<8x128xf32>
    %184 = math.tanh %183 : vector<8x128xf32>
    %185 = arith.mulf %178, %184 : vector<8x128xf32>
    %186 = tpu.concatenate %38, %59, %80, %101, %122, %143, %164, %185 in 0 : vector<8x128xf32>, vector<8x128xf32>, vector<8x128xf32>, vector<8x128xf32>, vector<8x128xf32>, vector<8x128xf32>, vector<8x128xf32>, vector<8x128xf32> -> vector<64x128xf32>
    %187 = arith.truncf %186 : vector<64x128xf32> to vector<64x128xbf16>
    %c0_33 = arith.constant 0 : index
    %c0_34 = arith.constant 0 : index
    %188 = vector.load %arg6[%c0_33, %c0_34] : memref<128x128xbf16, #tpu.memory_space<vmem>>, vector<128x128xbf16>
    %cst_35 = arith.constant dense<0.000000e+00> : vector<64x128xf32>
    %189 = tpu.matmul %187, %188, %cst_35 {dimension_numbers = #tpu.dot_dimension_numbers<[1], [0], [0], [1], [0, 0, 1, 1], [], []>} : vector<64x128xbf16>, vector<128x128xbf16>, vector<64x128xf32> -> vector<64x128xf32>
    %c0_36 = arith.constant 0 : index
    %c0_37 = arith.constant 0 : index
    %190 = vector.load %arg7[%c0_36, %c0_37] : memref<1x128xf32, #tpu.memory_space<vmem>>, vector<1x128xf32>
    %191 = vector.broadcast %190 : vector<1x128xf32> to vector<64x128xf32>
    %192 = arith.addf %189, %191 : vector<64x128xf32>
    %c0_38 = arith.constant 0 : index
    %c0_39 = arith.constant 0 : index
    %193 = vector.load %arg10[%c0_38, %c0_39] : memref<64x128xf32, #tpu.memory_space<vmem>>, vector<64x128xf32>
    tpu.vector_store %arg10[%c0_38, %c0_39], %192 {strides = array<i32>} : memref<64x128xf32, #tpu.memory_space<vmem>>, vector<64x128xf32>,
    %c0_40 = arith.constant 0 : index
    %c0_41 = arith.constant 0 : index
    %194 = vector.load %arg11[%c0_40, %c0_41] : memref<8x128xf32, #tpu.memory_space<vmem>>, vector<8x128xf32>
    tpu.vector_store %arg11[%c0_40, %c0_41], %185 {strides = array<i32>} : memref<8x128xf32, #tpu.memory_space<vmem>>, vector<8x128xf32>,
    %c0_42 = arith.constant 0 : index
    %c0_43 = arith.constant 0 : index
    %195 = vector.load %arg12[%c0_42, %c0_43] : memref<8x128xf32, #tpu.memory_space<vmem>>, vector<8x128xf32>
    tpu.vector_store %arg12[%c0_42, %c0_43], %183 {strides = array<i32>} : memref<8x128xf32, #tpu.memory_space<vmem>>, vector<8x128xf32>,
    return
  }
}

</mosaic_0001>

<bundles_post_ra>
// kernel: recurrent_wrapper_forward.1
= control target key start
LH: loop header
LB: loop body
LE: loop exit
PB: predicated region body
PF: predicated region fallthrough
CT: control target
= control target key end

     0   :  { %18 = vsyncpa [#allocation3], 0  ;;  %s3089_s0 = inlined_call_operand.vmem [shape: bf16[64,16], index: 0, kind: input, shape index: {}]   ;;  %s3090_s1 = inlined_call_operand.vmem [shape: bf16[16,128], index: 1, kind: input, shape index: {}]   ;;  %s3091_s2 = inlined_call_operand.vmem [shape: f32[1,128], index: 2, kind: input, shape index: {}]   ;;  %s3092_s3 = inlined_call_operand.hbm [shape: bf16[128,512], index: 3, kind: input, shape index: {}]   ;;  %s3093_s4 = inlined_call_operand.hbm [shape: bf16[128,512], index: 4, kind: input, shape index: {}]   ;;  %s3094_s5 = inlined_call_operand.vmem [shape: f32[1,512], index: 5, kind: input, shape index: {}]   ;;  %s3095_s6 = inlined_call_operand.vmem [shape: bf16[128,128], index: 6, kind: input, shape index: {}]   ;;  %s3096_s7 = inlined_call_operand.vmem [shape: f32[1,128], index: 7, kind: input, shape index: {}]   ;;  %s3097_s8 = inlined_call_operand.vmem [shape: f32[8,128], index: 8, kind: input, shape index: {}, may-alias: {8,9}]   ;;  %s3098_s9 = inlined_call_operand.vmem [shape: f32[8,128], index: 9, kind: input, shape index: {}, may-alias: {8,9}]   ;;  %s3099_s10 = inlined_call_operand.vmem [shape: f32[64,128], index: 10, kind: output, shape index: {0}]   ;;  %s3100_s11 = inlined_call_operand.hbm [shape: f32[8,128], index: 11, kind: output, shape index: {1}]   ;;  %s3101_s12 = inlined_call_operand.hbm [shape: f32[8,128], index: 12, kind: output, shape index: {2}]  }
   0x1   :  { %19 = vsyncpa [#allocation6], 0 }
   0x2   :  { %20 = vsyncpa [#allocation4], 0 }
   0x3   :  { %21 = vsyncpa [#allocation9], 0  ;;  %s2357_s21 = smov [#allocation2]   ;;  %s2261_s25 = scalar_lea.hbm %s3092_s3, 4096 }
   0x4   :  { %s33_s22 = sshll.u32 %s2357_s21, 4  ;;  %p2262_p0 = scmp.ne.s32.totalorder %s3092_s3, %s2261_s25  ;;  %s34_s22 = int_to_ptr.vmem [resolvable:$true] %s33_s22 }
   0x5   :  { %p2265_p1 = scmp.lt.u32.totalorder %s2261_s25, %s3092_s3 }
   0x7   :  { %p2267_p2 = pnand %p2265_p1, %p2262_p0 }
   0x9   :  { %2270 = shalt.err (!%p2267_p2)
}
   0xa   :  { %s2271_s30 = scalar_lea.vmem %s34_s22, 4096  ;;  %p2276_p4 = scmp.lt.s32.totalorder %s34_s22, %s34_s22 }
   0xb   :  { %p2272_p3 = scmp.ne.s32.totalorder %s34_s22, %s2271_s30  ;;  %p2277_p5 = scmp.lt.s32.totalorder %s2271_s30, %s2271_s30 }
   0xd   :  { %p2278_p6 = por %p2277_p5, %p2276_p4 }
   0xf   :  { %p2279_p7 = pnand %p2278_p6, %p2272_p3 }
  0x11   :  { %2282 = shalt.err (!%p2279_p7)
}
  0x12   :  { %s2358_s13 = smov 256   ;;  %s2359_s14 = smov 16  }
  0x13   :  { %39 = dma.hbm_to_vmem [thread:$0]  %s3092_s3, 4096, %s34_s22, [#allocation3], %s2358_s13, %s2358_s13, %s2359_s14  }
  0x14   :  { %s2360_s17 = smov [#allocation5]   ;;  %s2283_s21 = scalar_lea.hbm %s3093_s4, 4096 }
  0x15   :  { %s45_s18 = sshll.u32 %s2360_s17, 4  ;;  %p2284_p8 = scmp.ne.s32.totalorder %s3093_s4, %s2283_s21  ;;  %s46_s18 = int_to_ptr.vmem [resolvable:$true] %s45_s18 }
  0x16   :  { %p2287_p9 = scmp.lt.u32.totalorder %s2283_s21, %s3093_s4 }
  0x18   :  { %p2289_p10 = pnand %p2287_p9, %p2284_p8 }
  0x1a   :  { %2292 = shalt.err (!%p2289_p10)
}
  0x1b   :  { %s2293_s27 = scalar_lea.vmem %s46_s18, 4096  ;;  %p2298_p12 = scmp.lt.s32.totalorder %s46_s18, %s46_s18 }
  0x1c   :  { %p2294_p11 = scmp.ne.s32.totalorder %s46_s18, %s2293_s27  ;;  %p2299_p13 = scmp.lt.s32.totalorder %s2293_s27, %s2293_s27 }
  0x1e   :  { %p2300_p0 = por %p2299_p13, %p2298_p12 }
  0x20   :  { %p2301_p1 = pnand %p2300_p0, %p2294_p11 }
  0x22   :  { %2304 = shalt.err (!%p2301_p1)
}
  0x23   :  { %51 = dma.hbm_to_vmem [thread:$0]  %s3093_s4, 4096, %s46_s18, [#allocation6], %s2358_s13, %s2358_s13, %s2359_s14  }
  0x24   :  { %2349 = dma.done.wait [#allocation3], 4096  }
  0x25   :  { %2350 = vsyncadd [#allocation3], 4294963200 }
  0x26   :  { %2351 = dma.done.wait [#allocation6], 4096  }
  0x27   :  { %2352 = vsyncadd [#allocation6], 4294963200  ;;  %v1993_v0 = vld [vmem:[%s3090_s1] sm:$0xff]   ;;  %vm112_vm0 = vcmask 130048   ;;  %v1995_v2 = vld [vmem:[%s3089_s0 + $0x8] sm:$0xff]   ;;  %v3102_v38 = vmov 0  }
  0x28   :  { %v1994_v1 = vld [vmem:[%s3089_s0] sm:$0xff]   ;;  %1952 = vmatprep.subr.bf16.mxu1 %v1993_v0  ;;  %v1996_v3 = vld [vmem:[%s3089_s0 + $0x10] sm:$0xff]   ;;  %v1997_v7 = vld [vmem:[%s3089_s0 + $0x18] sm:$0xff]   ;;  %448 = vmatprep.mubr.bf16.mxu0 %v3102_v38 }
  0x29   :  { %1953 = vmatpush3.bf16.msra.mxu1 %v1993_v0  ;;  %1954 = vmatprep.mubr.msk.bf16.mxu1 %vm112_vm0, %v1994_v1  ;;  %v1998_v4 = vld [vmem:[#allocation2 + $0x4] ss:$16 sps:$4 sm:$0xff]   ;;  %v2000_v5 = vld [vmem:[#allocation2] ss:$16 sps:$4 sm:$0xff]   ;;  %v2047_v37 = vld [vmem:[#allocation2 + $0xc] ss:$16 sps:$4 sm:$0xff]  }
  0x2a   :  { %416 = vmatprep.subr.bf16.mxu0 %v1998_v4  ;;  %v2468_v6 = vld [vmem:[#allocation5 + $0x4] ss:$16 sps:$4 sm:$0xff]   ;;  %v2473_v9 = vld [vmem:[#allocation5] ss:$16 sps:$4 sm:$0xff]   ;;  %v2045_v55 = vld [vmem:[#allocation2 + $0x8] ss:$16 sps:$4 sm:$0xff]  }
  0x2b   :  { %417 = vmatpush1.bf16.msra.mxu0 %v2000_v5  ;;  %v2003_v8 = vld [vmem:[#allocation2 + $0x24] ss:$16 sps:$4 sm:$0xff]   ;;  %v2006_v10 = vld [vmem:[#allocation2 + $0x20] ss:$16 sps:$4 sm:$0xff]   ;;  %757 = vmatprep.subr.bf16.mxu1 %v2468_v6  ;;  %v2051_v58 = vld [vmem:[#allocation2 + $0x2c] ss:$16 sps:$4 sm:$0xff]  }
  0x2c   :  { %1955 = vmatmul.mubr.msk.bf16.vlgmr.msra.gmra.mrb[0].mxu1 %vm112_vm0, %v1995_v2  ;;  %v2476_v11 = vld [vmem:[#allocation5 + $0x24] ss:$16 sps:$4 sm:$0xff]   ;;  %418 = vmatprep.subr.bf16.mxu0 %v2003_v8  ;;  %v2480_v13 = vld [vmem:[#allocation5 + $0x20] ss:$16 sps:$4 sm:$0xff]   ;;  %v2049_v0 = vld [vmem:[#allocation2 + $0x28] ss:$16 sps:$4 sm:$0xff]  }
  0x2d   :  { %1958 = vmatprep.mubr.msk.bf16.mxu1 %vm112_vm0, %v1996_v3  ;;  %758 = vmatpush1.bf16.msra.mxu1 %v2473_v9  ;;  %v2009_v12 = vld [vmem:[#allocation2 + $0x44] ss:$16 sps:$4 sm:$0xff]   ;;  %v2012_v14 = vld [vmem:[#allocation2 + $0x40] ss:$16 sps:$4 sm:$0xff]   ;;  %v2054_v5 = vld [vmem:[#allocation2 + $0x4c] ss:$16 sps:$4 sm:$0xff]  }
  0x2e   :  { %759 = vmatprep.subr.bf16.mxu1 %v2476_v11  ;;  %v2482_v15 = vld [vmem:[#allocation5 + $0x44] ss:$16 sps:$4 sm:$0xff]   ;;  %v2486_v17 = vld [vmem:[#allocation5 + $0x40] ss:$16 sps:$4 sm:$0xff]  }
  0x2f   :  { %419 = vmatpush1.bf16.msra.mxu0 %v2006_v10  ;;  %v2015_v16 = vld [vmem:[#allocation2 + $0x64] ss:$16 sps:$4 sm:$0xff]   ;;  %v2018_v18 = vld [vmem:[#allocation2 + $0x60] ss:$16 sps:$4 sm:$0xff]  }
  0x30   :  { %420 = vmatprep.subr.bf16.mxu0 %v2009_v12  ;;  %v2489_v19 = vld [vmem:[#allocation5 + $0x64] ss:$16 sps:$4 sm:$0xff]   ;;  %v2491_v21 = vld [vmem:[#allocation5 + $0x60] ss:$16 sps:$4 sm:$0xff]   ;;  %v2052_v12 = vld [vmem:[#allocation2 + $0x48] ss:$16 sps:$4 sm:$0xff]  }
  0x31   :  { %760 = vmatpush1.bf16.msra.mxu1 %v2480_v13  ;;  %v2021_v20 = vld [vmem:[#allocation2 + $0x84] ss:$16 sps:$4 sm:$0xff]   ;;  %v2024_v22 = vld [vmem:[#allocation2 + $0x80] ss:$16 sps:$4 sm:$0xff]  }
  0x32   :  { %761 = vmatprep.subr.bf16.mxu1 %v2482_v15  ;;  %v2494_v23 = vld [vmem:[#allocation5 + $0x84] ss:$16 sps:$4 sm:$0xff]   ;;  %v2497_v25 = vld [vmem:[#allocation5 + $0x80] ss:$16 sps:$4 sm:$0xff]  }
  0x33   :  { %421 = vmatpush1.bf16.msra.mxu0 %v2012_v14  ;;  %v2027_v24 = vld [vmem:[#allocation2 + $0xa4] ss:$16 sps:$4 sm:$0xff]   ;;  %v2030_v26 = vld [vmem:[#allocation2 + $0xa0] ss:$16 sps:$4 sm:$0xff]  }
  0x34   :  { %1959 = vmatmul.mubr.msk.bf16.gmra.mrb[4].mxu1 %vm112_vm0, %v1997_v7  ;;  %422 = vmatprep.subr.bf16.mxu0 %v2015_v16  ;;  %v2502_v27 = vld [vmem:[#allocation5 + $0xa4] ss:$16 sps:$4 sm:$0xff]   ;;  %v2504_v28 = vld [vmem:[#allocation5 + $0xa0] ss:$16 sps:$4 sm:$0xff]   ;;  %v2057_v16 = vld [vmem:[#allocation2 + $0x6c] ss:$16 sps:$4 sm:$0xff]  }
  0x35   :  { %762 = vmatpush1.bf16.msra.mxu1 %v2486_v17  ;;  %v2033_v29 = vld [vmem:[#allocation2 + $0xc4] ss:$16 sps:$4 sm:$0xff]   ;;  %v2036_v30 = vld [vmem:[#allocation2 + $0xc0] ss:$16 sps:$4 sm:$0xff]   ;;  %789 = vmatprep.mubr.bf16.mxu1 %v3102_v38 }
  0x36   :  { %763 = vmatprep.subr.bf16.mxu1 %v2489_v19  ;;  %v2508_v31 = vld [vmem:[#allocation5 + $0xc4] ss:$16 sps:$4 sm:$0xff]   ;;  %v2510_v32 = vld [vmem:[#allocation5 + $0xc0] ss:$16 sps:$4 sm:$0xff]  }
  0x37   :  { %423 = vmatpush1.bf16.msra.mxu0 %v2018_v18  ;;  %v2039_v33 = vld [vmem:[#allocation2 + $0xe4] ss:$16 sps:$4 sm:$0xff]   ;;  %v2042_v34 = vld [vmem:[#allocation2 + $0xe0] ss:$16 sps:$4 sm:$0xff]   ;;  %v2055_v18 = vld [vmem:[#allocation2 + $0x68] ss:$16 sps:$4 sm:$0xff]  }
  0x38   :  { %424 = vmatprep.subr.bf16.mxu0 %v2021_v20  ;;  %v2514_v35 = vld [vmem:[#allocation5 + $0xe4] ss:$16 sps:$4 sm:$0xff]   ;;  %v2516_v36 = vld [vmem:[#allocation5 + $0xe0] ss:$16 sps:$4 sm:$0xff]   ;;  %v2060_v20 = vld [vmem:[#allocation2 + $0x8c] ss:$16 sps:$4 sm:$0xff]  }
  0x39   :  { %764 = vmatpush1.bf16.msra.mxu1 %v2491_v21  ;;  %v594_v39 = vld [vmem:[%s3097_s8] sm:$0xff] }
  0x3a   :  { %765 = vmatprep.subr.bf16.mxu1 %v2494_v23  ;;  %v2525_v40 = vpack.c.bf16 %v594_v39, %v594_v39  ;;  %v1828_v41 = vld [vmem:[%s3091_s2] ss:$0 sm:$0xff]  ;;  %v2561_v39 = vld [vmem:[#allocation5 + $0x8] ss:$16 sps:$4 sm:$0xff]  }
  0x3b   :  { %425 = vmatpush1.bf16.msra.mxu0 %v2024_v22  ;;  %v2058_v22 = vld [vmem:[#allocation2 + $0x88] ss:$16 sps:$4 sm:$0xff]  }
  0x3c   :  { %426 = vmatprep.subr.bf16.mxu0 %v2027_v24  ;;  %v2063_v24 = vld [vmem:[#allocation2 + $0xac] ss:$16 sps:$4 sm:$0xff]  }
  0x3d   :  { %766 = vmatpush1.bf16.msra.mxu1 %v2497_v25 }
  0x3e   :  { %767 = vmatprep.subr.bf16.mxu1 %v2502_v27 }
  0x3f   :  { %427 = vmatpush1.bf16.msra.mxu0 %v2030_v26  ;;  %v2061_v26 = vld [vmem:[#allocation2 + $0xa8] ss:$16 sps:$4 sm:$0xff]  }
  0x40   :  { %428 = vmatprep.subr.bf16.mxu0 %v2033_v29  ;;  %v2066_v29 = vld [vmem:[#allocation2 + $0xcc] ss:$16 sps:$4 sm:$0xff]  }
  0x41   :  { %768 = vmatpush1.bf16.msra.mxu1 %v2504_v28 }
  0x42   :  { %769 = vmatprep.subr.bf16.mxu1 %v2508_v31 }
  0x43   :  { %429 = vmatpush1.bf16.msra.mxu0 %v2036_v30  ;;  %v2064_v30 = vld [vmem:[#allocation2 + $0xc8] ss:$16 sps:$4 sm:$0xff]  }
  0x44   :  { %430 = vmatprep.subr.bf16.mxu0 %v2039_v33  ;;  %v2069_v33 = vld [vmem:[#allocation2 + $0xec] ss:$16 sps:$4 sm:$0xff]  }
  0x45   :  { %770 = vmatpush1.bf16.msra.mxu1 %v2510_v32 }
  0x46   :  { %771 = vmatprep.subr.bf16.mxu1 %v2514_v35 }
  0x47   :  { %431 = vmatpush1.bf16.msra.mxu0 %v2042_v34  ;;  %v2067_v34 = vld [vmem:[#allocation2 + $0xe8] ss:$16 sps:$4 sm:$0xff]  }
  0x48   :  { %489 = vmatprep.subr.bf16.mxu0 %v2047_v37  ;;  %v2559_v37 = vld [vmem:[#allocation5 + $0xc] ss:$16 sps:$4 sm:$0xff]  }
  0x49   :  { %772 = vmatpush1.bf16.msra.mxu1 %v2516_v36 }
  0x4a   :  { %868 = vmatprep.subr.bf16.mxu1 %v2468_v6 }
  0x4c   :  { %790 = vmatmul.mubr.bf16.vlgmr.msra.gmra.mrb[8].mxu1 %v2525_v40 }
  0x4d   :  { %869 = vmatpush1.bf16.msra.mxu1 %v2473_v9  ;;  %900 = vmatprep.mubr.bf16.mxu1 %v3102_v38 }
  0x4e   :  { %870 = vmatprep.subr.bf16.mxu1 %v2476_v11 }
  0x51   :  { %871 = vmatpush1.bf16.msra.mxu1 %v2480_v13 }
  0x52   :  { %872 = vmatprep.subr.bf16.mxu1 %v2482_v15 }
  0x55   :  { %873 = vmatpush1.bf16.msra.mxu1 %v2486_v17 }
  0x56   :  { %874 = vmatprep.subr.bf16.mxu1 %v2489_v19 }
  0x59   :  { %875 = vmatpush1.bf16.msra.mxu1 %v2491_v21 }
  0x5a   :  { %876 = vmatprep.subr.bf16.mxu1 %v2494_v23 }
  0x5d   :  { %877 = vmatpush1.bf16.msra.mxu1 %v2497_v25 }
  0x5e   :  { %878 = vmatprep.subr.bf16.mxu1 %v2502_v27 }
  0x61   :  { %879 = vmatpush1.bf16.msra.mxu1 %v2504_v28 }
  0x62   :  { %880 = vmatprep.subr.bf16.mxu1 %v2508_v31 }
  0x65   :  { %881 = vmatpush1.bf16.msra.mxu1 %v2510_v32 }
  0x66   :  { %882 = vmatprep.subr.bf16.mxu1 %v2514_v35 }
  0x69   :  { %883 = vmatpush1.bf16.msra.mxu1 %v2516_v36 }
  0x6a   :  { %979 = vmatprep.subr.bf16.mxu1 %v2468_v6 }
  0xff   :  { %v1956_v42 = vpop.f32.mrb[0].mxu1 }
 0x100   :  { %v168_v43 = vadd.f32 %v1956_v42, %v1828_v41  ;;  %v159_v44 = vpop.f32.mrb[1].mxu1  ;;  %v2567_v42 = vld [vmem:[#allocation5 + $0x28] ss:$16 sps:$4 sm:$0xff]  }
 0x101   :  { %v160_v45 = vadd.f32 %v1828_v41, %v159_v44  ;;  %v1957_v46 = vpop.f32.mrb[2].mxu1  ;;  %v2574_v44 = vld [vmem:[#allocation5 + $0x48] ss:$16 sps:$4 sm:$0xff]  }
 0x102   :  { %v171_v47 = vadd.f32 %v1957_v46, %v1828_v41  ;;  %v162_v48 = vpop.f32.mrb[3].mxu1  ;;  %v192_v50 = vmax.f32 %v168_v43, 0.0  ;;  %v2571_v43 = vld [vmem:[#allocation5 + $0x4c] ss:$16 sps:$4 sm:$0xff]   ;;  %v2581_v46 = vld [vmem:[#allocation5 + $0x68] ss:$16 sps:$4 sm:$0xff]  }
 0x103   :  { %v163_v49 = vadd.f32 %v1828_v41, %v162_v48  ;;  %v190_v52 = vmax.f32 %v160_v45, 0.0  ;;  %v2577_v45 = vld [vmem:[#allocation5 + $0x6c] ss:$16 sps:$4 sm:$0xff]   ;;  %v2588_v48 = vld [vmem:[#allocation5 + $0x88] ss:$16 sps:$4 sm:$0xff]  }
 0x104   :  { %v193_v51 = vmax.f32 %v171_v47, 0.0  ;;  %v2585_v47 = vld [vmem:[#allocation5 + $0x8c] ss:$16 sps:$4 sm:$0xff]  }
 0x105   :  { %v191_v53 = vmax.f32 %v163_v49, 0.0  ;;  %v2591_v49 = vld [vmem:[#allocation5 + $0xac] ss:$16 sps:$4 sm:$0xff]  }
 0x106   :  { %v2549_v54 = vpack.c.bf16 %v193_v51, %v192_v50  ;;  %v2594_v50 = vld [vmem:[#allocation5 + $0xa8] ss:$16 sps:$4 sm:$0xff]   ;;  %v2598_v51 = vld [vmem:[#allocation5 + $0xcc] ss:$16 sps:$4 sm:$0xff]  }
 0x107   :  { %v198_v56 = vpack.c.bf16 %v191_v53, %v190_v52  ;;  %v1960_v57 = vpop.f32.mrb[4].mxu1  ;;  %v2601_v52 = vld [vmem:[#allocation5 + $0xc8] ss:$16 sps:$4 sm:$0xff]   ;;  %v2604_v53 = vld [vmem:[#allocation5 + $0xec] ss:$16 sps:$4 sm:$0xff]  }
 0x108   :  { %v184_v59 = vadd.f32 %v1960_v57, %v1828_v41  ;;  %v175_v60 = vpop.f32.mrb[5].mxu1 }
 0x109   :  { %449 = vmatmul.mubr.bf16.vlgmr.msra.gmra.mrb[0].mxu0 %v198_v56  ;;  %v176_v61 = vadd.f32 %v1828_v41, %v175_v60  ;;  %v1961_v62 = vpop.f32.mrb[6].mxu1 }
 0x10a   :  { %490 = vmatpush1.bf16.msra.mxu0 %v2045_v55  ;;  %v196_v63 = vmax.f32 %v184_v59, 0.0  ;;  %v187_v1 = vadd.f32 %v1961_v62, %v1828_v41  ;;  %v178_v2 = vpop.f32.mrb[7].mxu1  ;;  %458 = vmatprep.mubr.bf16.mxu0 %v3102_v38 }
 0x10b   :  { %491 = vmatprep.subr.bf16.mxu0 %v2051_v58  ;;  %v194_v3 = vmax.f32 %v176_v61, 0.0  ;;  %v179_v4 = vadd.f32 %v1828_v41, %v178_v2  ;;  %v2564_v41 = vld [vmem:[#allocation5 + $0x2c] ss:$16 sps:$4 sm:$0xff]   ;;  %v236_v58 = vlaneseq  ;;  %v234_v61 = vld [vmem:[%s3094_s5] sm:$0xf]  ;;  %s2362_s5 = smov [#allocation7]  }
 0x10c   :  { %v197_v7 = vmax.f32 %v187_v1, 0.0  ;;  %s1802_s21 = sshll.u32 %s2362_s5, 4  ;;  %s1803_s21 = int_to_ptr.vmem [resolvable:$true] %s1802_s21 }
 0x10d   :  { %v195_v8 = vmax.f32 %v179_v4, 0.0  ;;  %v237_v59 = vshrl.u32 %v236_v58, 7  ;;  %s2305_s24 = scalar_lea.vmem %s1803_s21, 128  ;;  %p2310_p3 = scmp.lt.s32.totalorder %s1803_s21, %s1803_s21 }
 0x10e   :  { %492 = vmatpush1.bf16.msra.mxu0 %v2049_v0  ;;  %v2552_v10 = vpack.c.bf16 %v197_v7, %v196_v63  ;;  %p2306_p2 = scmp.ne.s32.totalorder %s1803_s21, %s2305_s24  ;;  %p2311_p4 = scmp.lt.s32.totalorder %s2305_s24, %s2305_s24 }
 0x10f   :  { %v200_v14 = vpack.c.bf16 %v195_v8, %v194_v3  ;;  %493 = vmatprep.subr.bf16.mxu0 %v2054_v5  ;;  %v238_v60 = vsub.s32 0, %v237_v59  ;;  %v242_v62 = vsub.s32 1, %v237_v59 }
 0x110   :  { %p2312_p5 = por %p2311_p4, %p2310_p3 }
 0x111   :  { %459 = vmatmul.mubr.bf16.gmra.mrb[4].mxu0 %v2549_v54  ;;  %v239_v63 = vrot.slane %v234_v61, %v238_v60  ;;  %v243_v0 = vrot.slane %v234_v61, %v242_v62 }
 0x112   :  { %494 = vmatpush1.bf16.msra.mxu0 %v2052_v12  ;;  %468 = vmatprep.mubr.bf16.mxu0 %v3102_v38  ;;  %p2313_p6 = pnand %p2312_p5, %p2306_p2 }
 0x113   :  { %495 = vmatprep.subr.bf16.mxu0 %v2057_v16 }
 0x116   :  { %496 = vmatpush1.bf16.msra.mxu0 %v2055_v18 }
 0x117   :  { %497 = vmatprep.subr.bf16.mxu0 %v2060_v20 }
 0x119   :  { %469 = vmatmul.mubr.bf16.gmra.mrb[8].mxu0 %v200_v14 }
 0x11a   :  { %498 = vmatpush1.bf16.msra.mxu0 %v2058_v22  ;;  %478 = vmatprep.mubr.bf16.mxu0 %v3102_v38 }
 0x11b   :  { %499 = vmatprep.subr.bf16.mxu0 %v2063_v24 }
 0x11e   :  { %500 = vmatpush1.bf16.msra.mxu0 %v2061_v26 }
 0x11f   :  { %501 = vmatprep.subr.bf16.mxu0 %v2066_v29 }
 0x121   :  { %479 = vmatmul.mubr.bf16.gmra.mrb[12].mxu0 %v2552_v10 }
 0x122   :  { %502 = vmatpush1.bf16.msra.mxu0 %v2064_v30  ;;  %521 = vmatprep.mubr.bf16.mxu0 %v3102_v38 }
 0x123   :  { %503 = vmatprep.subr.bf16.mxu0 %v2069_v33 }
 0x126   :  { %504 = vmatpush1.bf16.msra.mxu0 %v2067_v34 }
 0x127   :  { %798 = vmatprep.subr.bf16.mxu0 %v2559_v37 }
 0x129   :  { %522 = vmatmul.mubr.bf16.vlgmr.msra.gmra.mrb[16].mxu0 %v198_v56 }
 0x12a   :  { %799 = vmatpush1.bf16.msra.mxu0 %v2561_v39  ;;  %531 = vmatprep.mubr.bf16.mxu0 %v3102_v38 }
 0x12b   :  { %800 = vmatprep.subr.bf16.mxu0 %v2564_v41 }
 0x12e   :  { %801 = vmatpush1.bf16.msra.mxu0 %v2567_v42 }
 0x12f   :  { %802 = vmatprep.subr.bf16.mxu0 %v2571_v43 }
 0x131   :  { %532 = vmatmul.mubr.bf16.gmra.mrb[20].mxu0 %v2549_v54  ;;  %v2608_v54 = vld [vmem:[#allocation5 + $0xe8] ss:$16 sps:$4 sm:$0xff]  }
 0x132   :  { %803 = vmatpush1.bf16.msra.mxu0 %v2574_v44  ;;  %541 = vmatprep.mubr.bf16.mxu0 %v3102_v38 }
 0x133   :  { %804 = vmatprep.subr.bf16.mxu0 %v2577_v45 }
 0x136   :  { %805 = vmatpush1.bf16.msra.mxu0 %v2581_v46 }
 0x137   :  { %806 = vmatprep.subr.bf16.mxu0 %v2585_v47 }
 0x139   :  { %542 = vmatmul.mubr.bf16.gmra.mrb[24].mxu0 %v200_v14 }
 0x13a   :  { %807 = vmatpush1.bf16.msra.mxu0 %v2588_v48  ;;  %551 = vmatprep.mubr.bf16.mxu0 %v3102_v38 }
 0x13b   :  { %808 = vmatprep.subr.bf16.mxu0 %v2591_v49 }
 0x13e   :  { %809 = vmatpush1.bf16.msra.mxu0 %v2594_v50 }
 0x13f   :  { %810 = vmatprep.subr.bf16.mxu0 %v2598_v51 }
 0x141   :  { %552 = vmatmul.mubr.bf16.gmra.mrb[28].mxu0 %v2552_v10 }
 0x142   :  { %811 = vmatpush1.bf16.msra.mxu0 %v2601_v52  ;;  %830 = vmatprep.mubr.bf16.mxu0 %v3102_v38 }
 0x143   :  { %812 = vmatprep.subr.bf16.mxu0 %v2604_v53 }
 0x146   :  { %813 = vmatpush1.bf16.msra.mxu0 %v2608_v54 }
 0x147   :  { %909 = vmatprep.subr.bf16.mxu0 %v2559_v37 }
 0x149   :  { %831 = vmatmul.mubr.bf16.vlgmr.msra.gmra.mrb[32].mxu0 %v2525_v40  ;;  %v791_v40 = vpop.f32.mrb[8].mxu1 }
 0x14a   :  { %910 = vmatpush1.bf16.msra.mxu0 %v2561_v39  ;;  %941 = vmatprep.mubr.bf16.mxu0 %v3102_v38  ;;  %v793_v55 = vpop.f32.mrb[9].mxu1 }
 0x14b   :  { %911 = vmatprep.subr.bf16.mxu0 %v2564_v41  ;;  %v795_v56 = vpop.f32.mrb[10].mxu1 }
 0x14c   :  { %v796_v57 = vpop.f32.mrb[11].mxu1 }
 0x14e   :  { %912 = vmatpush1.bf16.msra.mxu0 %v2567_v42 }
 0x14f   :  { %913 = vmatprep.subr.bf16.mxu0 %v2571_v43 }
 0x152   :  { %914 = vmatpush1.bf16.msra.mxu0 %v2574_v44 }
 0x153   :  { %915 = vmatprep.subr.bf16.mxu0 %v2577_v45 }
 0x156   :  { %916 = vmatpush1.bf16.msra.mxu0 %v2581_v46 }
 0x157   :  { %917 = vmatprep.subr.bf16.mxu0 %v2585_v47 }
 0x15a   :  { %918 = vmatpush1.bf16.msra.mxu0 %v2588_v48 }
 0x15b   :  { %919 = vmatprep.subr.bf16.mxu0 %v2591_v49 }
 0x15e   :  { %920 = vmatpush1.bf16.msra.mxu0 %v2594_v50 }
 0x15f   :  { %921 = vmatprep.subr.bf16.mxu0 %v2598_v51 }
 0x162   :  { %922 = vmatpush1.bf16.msra.mxu0 %v2601_v52 }
 0x163   :  { %923 = vmatprep.subr.bf16.mxu0 %v2604_v53 }
 0x166   :  { %924 = vmatpush1.bf16.msra.mxu0 %v2608_v54 }
 0x167   :  { %1020 = vmatprep.subr.bf16.mxu0 %v2559_v37 }
 0x1dc   :  { %v450_v1 = vpop.f32.mrb[0].mxu0 }
 0x1dd   :  { %v451_v2 = vadd.f32 %v450_v1, %v239_v63  ;;  %v452_v3 = vpop.f32.mrb[1].mxu0 }
 0x1de   :  { %v453_v4 = vadd.f32 %v452_v3, %v243_v0  ;;  %v454_v5 = vpop.f32.mrb[2].mxu0 }
 0x1df   :  { %v2635_v7 = vadd.f32 %v454_v5, %v239_v63  ;;  %v839_v8 = vadd.f32 %v791_v40, %v451_v2  ;;  %v456_v10 = vpop.f32.mrb[3].mxu0 }
 0x1e0   :  { %v2637_v12 = vadd.f32 %v456_v10, %v243_v0  ;;  %v840_v14 = vadd.f32 %v793_v55, %v453_v4 }
 0x1e4   :  { %v460_v16 = vpop.f32.mrb[4].mxu0 }
 0x1e5   :  { %v2639_v18 = vadd.f32 %v460_v16, %v239_v63  ;;  %v462_v20 = vpop.f32.mrb[5].mxu0 }
 0x1e6   :  { %v2641_v22 = vadd.f32 %v462_v20, %v243_v0  ;;  %v464_v24 = vpop.f32.mrb[6].mxu0  ;;  %v246_v20 = vsub.s32 2, %v237_v59 }
 0x1e7   :  { %v2643_v26 = vadd.f32 %v464_v24, %v239_v63  ;;  %v466_v29 = vpop.f32.mrb[7].mxu0  ;;  %v250_v24 = vsub.s32 3, %v237_v59 }
 0x1e8   :  { %v2645_v30 = vadd.f32 %v466_v29, %v243_v0 }
 0x1ec   :  { %v470_v33 = vpop.f32.mrb[8].mxu0 }
 0x1ed   :  { %v2647_v34 = vadd.f32 %v470_v33, %v239_v63  ;;  %v472_v40 = vpop.f32.mrb[9].mxu0  ;;  %v247_v33 = vrot.slane %v234_v61, %v246_v20  ;;  %v1903_v20 = vmul.f32 -1.442695, %v840_v14 }
 0x1ee   :  { %v2649_v56 = vadd.f32 %v472_v40, %v243_v0  ;;  %v474_v57 = vpop.f32.mrb[10].mxu0 }
 0x1ef   :  { %3104 = vst [vmem:[#allocation14_spill] sm:$0xff] %v2647_v34  ;;  %v2651_v55 = vadd.f32 %v474_v57, %v239_v63  ;;  %v476_v58 = vpop.f32.mrb[11].mxu0  ;;  %v251_v57 = vrot.slane %v234_v61, %v250_v24  ;;  %v1902_v61 = vmul.f32 -1.442695, %v839_v8  ;;  %2102 = vpow2.f32 %v1903_v20 }
 0x1f0   :  { %3105 = vst [vmem:[#allocation15_spill] sm:$0xff] %v2649_v56  ;;  %v2653_v60 = vadd.f32 %v476_v58, %v243_v0 }
 0x1f1   :  { %3106 = vst [vmem:[#allocation16_spill] sm:$0xff] %v2651_v55  ;;  %2104 = vpow2.f32 %v1902_v61 }
 0x1f2   :  { %3107 = vst [vmem:[#allocation17_spill] sm:$0xff] %v2653_v60 }
 0x1f4   :  { %v480_v62 = vpop.f32.mrb[12].mxu0 }
 0x1f5   :  { %v2655_v1 = vadd.f32 %v480_v62, %v239_v63  ;;  %v482_v2 = vpop.f32.mrb[13].mxu0 }
 0x1f6   :  { %v2657_v3 = vadd.f32 %v482_v2, %v243_v0  ;;  %v484_v4 = vpop.f32.mrb[14].mxu0 }
 0x1f7   :  { %3108 = vst [vmem:[#allocation18_spill] sm:$0xff] %v2655_v1  ;;  %v2659_v5 = vadd.f32 %v484_v4, %v239_v63  ;;  %v486_v10 = vpop.f32.mrb[15].mxu0 }
 0x1f8   :  { %3109 = vst [vmem:[#allocation19_spill] sm:$0xff] %v2657_v3  ;;  %v2661_v16 = vadd.f32 %v486_v10, %v243_v0 }
 0x1f9   :  { %3110 = vst [vmem:[#allocation20_spill] sm:$0xff] %v2659_v5  ;;  %v2103_v20 = vpop.eup %2102 }
 0x1fa   :  { %3111 = vst [vmem:[#allocation21_spill] sm:$0xff] %v2661_v16 }
 0x1fb   :  { %v2105_v61 = vpop.eup %2104 }
 0x1fc   :  { %v523_v29 = vpop.f32.mrb[16].mxu0 }
 0x1fd   :  { %v525_v40 = vpop.f32.mrb[17].mxu0 }
 0x1fe   :  { %v527_v58 = vpop.f32.mrb[18].mxu0  ;;  %v526_v34 = vadd.f32 %v525_v40, %v251_v57 }
 0x1ff   :  { %v2663_v38 = vadd.f32 %v527_v58, %v247_v33  ;;  %v529_v62 = vpop.f32.mrb[19].mxu0 }
 0x200   :  { %v2665_v1 = vadd.f32 %v529_v62, %v251_v57 }
 0x204   :  { %v533_v2 = vpop.f32.mrb[20].mxu0 }
 0x205   :  { %v2667_v3 = vadd.f32 %v533_v2, %v247_v33  ;;  %v535_v63 = vpop.f32.mrb[21].mxu0 }
 0x206   :  { %v2669_v4 = vadd.f32 %v535_v63, %v251_v57  ;;  %v537_v0 = vpop.f32.mrb[22].mxu0 }
 0x207   :  { %v2671_v10 = vadd.f32 %v537_v0, %v247_v33  ;;  %v539_v59 = vpop.f32.mrb[23].mxu0 }
 0x208   :  { %v2673_v16 = vadd.f32 %v539_v59, %v251_v57 }
 0x20a   :  { %3112 = vst [vmem:[#allocation22_spill] sm:$0xff] %v2673_v16 }
 0x20c   :  { %v543_v24 = vpop.f32.mrb[24].mxu0 }
 0x20d   :  { %v2675_v58 = vadd.f32 %v543_v24, %v247_v33  ;;  %v545_v62 = vpop.f32.mrb[25].mxu0 }
 0x20e   :  { %v2677_v5 = vadd.f32 %v545_v62, %v251_v57  ;;  %v547_v2 = vpop.f32.mrb[26].mxu0 }
 0x20f   :  { %3113 = vst [vmem:[#allocation23_spill] sm:$0xff] %v2675_v58  ;;  %v2679_v60 = vadd.f32 %v547_v2, %v247_v33  ;;  %v549_v63 = vpop.f32.mrb[27].mxu0  ;;  %v852_v2 = vadd.f32 1.0, %v2105_v61 }
 0x210   :  { %3114 = vst [vmem:[#allocation24_spill] sm:$0xff] %v2677_v5  ;;  %v2681_v55 = vadd.f32 %v549_v63, %v251_v57  ;;  %v853_v5 = vadd.f32 1.0, %v2103_v20 }
 0x211   :  { %3115 = vst [vmem:[#allocation25_spill] sm:$0xff] %v2679_v60  ;;  %v524_v60 = vadd.f32 %v523_v29, %v247_v33 }
 0x212   :  { %3116 = vst [vmem:[#allocation26_spill] sm:$0xff] %v2681_v55  ;;  %2106 = vrcp.f32 %v853_v5 }
 0x213   :  { %2108 = vrcp.f32 %v852_v2 }
 0x214   :  { %v553_v0 = vpop.f32.mrb[28].mxu0 }
 0x215   :  { %v2683_v56 = vadd.f32 %v553_v0, %v247_v33  ;;  %v555_v59 = vpop.f32.mrb[29].mxu0 }
 0x216   :  { %v2685_v14 = vadd.f32 %v555_v59, %v251_v57  ;;  %v557_v8 = vpop.f32.mrb[30].mxu0 }
 0x217   :  { %3117 = vst [vmem:[#allocation27_spill] sm:$0xff] %v2683_v56  ;;  %v2687_v24 = vadd.f32 %v557_v8, %v247_v33  ;;  %v559_v58 = vpop.f32.mrb[31].mxu0 }
 0x218   :  { %3118 = vst [vmem:[#allocation28_spill] sm:$0xff] %v2685_v14  ;;  %v2689_v62 = vadd.f32 %v559_v58, %v251_v57  ;;  %v595_v58 = vld [vmem:[%s3098_s9] sm:$0xff]  ;;  %s2363_s9 = smov [#allocation8]  }
 0x219   :  { %s1812_s23 = sshll.u32 %s2363_s9, 4  ;;  %s1813_s23 = int_to_ptr.vmem [resolvable:$true] %s1812_s23 }
 0x21c   :  { %v832_v63 = vpop.f32.mrb[32].mxu0  ;;  %v2107_v8 = vpop.eup %2106 }
 0x21d   :  { %v841_v55 = vadd.f32 %v832_v63, %v524_v60  ;;  %v834_v16 = vpop.f32.mrb[33].mxu0  ;;  %v2109_v20 = vpop.eup %2108  ;;  %v862_v33 = vmul.f32 %v2107_v8, %v595_v58 }
 0x21e   :  { %v842_v0 = vadd.f32 %v834_v16, %v526_v34  ;;  %v836_v56 = vpop.f32.mrb[34].mxu0  ;;  %v3119_v16 = vmov 0  }
 0x21f   :  { %v1904_v59 = vmul.f32 -1.442695, %v841_v55  ;;  %v837_v14 = vpop.f32.mrb[35].mxu0 }
 0x220   :  { %2110 = vtanh.f32 %v842_v0 }
 0x221   :  { %2112 = vpow2.f32 %v1904_v59 }
 0x22a   :  { %v2111_v61 = vpop.eup %2110 }
 0x22b   :  { %v2113_v29 = vpop.eup %2112  ;;  %v863_v40 = vmul.f32 %v2111_v61, %v2109_v20 }
 0x22c   :  { %v854_v60 = vadd.f32 1.0, %v2113_v29 }
 0x22d   :  { %v2694_v57 = vadd.f32 %v863_v40, %v862_v33 }
 0x22e   :  { %2114 = vrcp.f32 %v854_v60 }
 0x22f   :  { %2116 = vtanh.f32 %v2694_v57 }
 0x238   :  { %v2115_v34 = vpop.eup %2114 }
 0x239   :  { %v2117_v56 = vpop.eup %2116 }
 0x23a   :  { %v2697_v55 = vmul.f32 %v2117_v56, %v2115_v34 }
 0x23c   :  { %v867_v5 = vpack.c.bf16 %v2697_v55, %v2697_v55 }
 0x23e   :  { %901 = vmatmul.mubr.bf16.vlgmr.msra.gmra.mrb[12].mxu1 %v867_v5  ;;  %942 = vmatmul.mubr.bf16.vlgmr.msra.gmra.mrb[36].mxu0 %v867_v5 }
 0x23f   :  { %980 = vmatpush1.bf16.msra.mxu1 %v2473_v9  ;;  %1021 = vmatpush1.bf16.msra.mxu0 %v2561_v39 }
 0x240   :  { %981 = vmatprep.subr.bf16.mxu1 %v2476_v11  ;;  %1022 = vmatprep.subr.bf16.mxu0 %v2564_v41 }
 0x241   :  { %1011 = vmatprep.mubr.bf16.mxu1 %v3119_v16  ;;  %1052 = vmatprep.mubr.bf16.mxu0 %v3119_v16 }
 0x243   :  { %982 = vmatpush1.bf16.msra.mxu1 %v2480_v13  ;;  %1023 = vmatpush1.bf16.msra.mxu0 %v2567_v42 }
 0x244   :  { %983 = vmatprep.subr.bf16.mxu1 %v2482_v15  ;;  %1024 = vmatprep.subr.bf16.mxu0 %v2571_v43 }
 0x247   :  { %984 = vmatpush1.bf16.msra.mxu1 %v2486_v17  ;;  %1025 = vmatpush1.bf16.msra.mxu0 %v2574_v44 }
 0x248   :  { %985 = vmatprep.subr.bf16.mxu1 %v2489_v19  ;;  %1026 = vmatprep.subr.bf16.mxu0 %v2577_v45 }
 0x24b   :  { %986 = vmatpush1.bf16.msra.mxu1 %v2491_v21  ;;  %1027 = vmatpush1.bf16.msra.mxu0 %v2581_v46 }
 0x24c   :  { %987 = vmatprep.subr.bf16.mxu1 %v2494_v23  ;;  %1028 = vmatprep.subr.bf16.mxu0 %v2585_v47 }
 0x24f   :  { %988 = vmatpush1.bf16.msra.mxu1 %v2497_v25  ;;  %1029 = vmatpush1.bf16.msra.mxu0 %v2588_v48 }
 0x250   :  { %989 = vmatprep.subr.bf16.mxu1 %v2502_v27  ;;  %1030 = vmatprep.subr.bf16.mxu0 %v2591_v49 }
 0x253   :  { %990 = vmatpush1.bf16.msra.mxu1 %v2504_v28  ;;  %1031 = vmatpush1.bf16.msra.mxu0 %v2594_v50 }
 0x254   :  { %991 = vmatprep.subr.bf16.mxu1 %v2508_v31  ;;  %1032 = vmatprep.subr.bf16.mxu0 %v2598_v51 }
 0x257   :  { %992 = vmatpush1.bf16.msra.mxu1 %v2510_v32  ;;  %1033 = vmatpush1.bf16.msra.mxu0 %v2601_v52 }
 0x258   :  { %993 = vmatprep.subr.bf16.mxu1 %v2514_v35  ;;  %1034 = vmatprep.subr.bf16.mxu0 %v2604_v53 }
 0x25b   :  { %994 = vmatpush1.bf16.msra.mxu1 %v2516_v36  ;;  %1035 = vmatpush1.bf16.msra.mxu0 %v2608_v54 }
 0x25c   :  { %1090 = vmatprep.subr.bf16.mxu1 %v2468_v6  ;;  %1131 = vmatprep.subr.bf16.mxu0 %v2559_v37 }
 0x311   :  { %v902_v14 = vpop.f32.mrb[12].mxu1  ;;  %v943_v2 = vpop.f32.mrb[36].mxu0 }
 0x312   :  { %v950_v63 = vadd.f32 %v902_v14, %v2635_v7  ;;  %v952_v0 = vadd.f32 %v943_v2, %v2663_v38  ;;  %v904_v59 = vpop.f32.mrb[13].mxu1  ;;  %v945_v8 = vpop.f32.mrb[37].mxu0 }
 0x313   :  { %v951_v58 = vadd.f32 %v904_v59, %v2637_v12  ;;  %v953_v20 = vadd.f32 %v945_v8, %v2665_v1  ;;  %v906_v61 = vpop.f32.mrb[14].mxu1  ;;  %v947_v29 = vpop.f32.mrb[38].mxu0 }
 0x314   :  { %v1905_v33 = vmul.f32 -1.442695, %v950_v63  ;;  %v907_v40 = vpop.f32.mrb[15].mxu1  ;;  %v948_v60 = vpop.f32.mrb[39].mxu0  ;;  %v1907_v34 = vmul.f32 -1.442695, %v952_v0 }
 0x315   :  { %v1906_v6 = vmul.f32 -1.442695, %v951_v58 }
 0x316   :  { %2118 = vpow2.f32 %v1905_v33 }
 0x317   :  { %2120 = vpow2.f32 %v1906_v6 }
 0x318   :  { %2122 = vtanh.f32 %v953_v20 }
 0x319   :  { %2124 = vpow2.f32 %v1907_v34 }
 0x320   :  { %v2119_v56 = vpop.eup %2118 }
 0x321   :  { %v963_v5 = vadd.f32 1.0, %v2119_v56  ;;  %v2121_v7 = vpop.eup %2120 }
 0x322   :  { %v964_v38 = vadd.f32 1.0, %v2121_v7  ;;  %v2123_v12 = vpop.eup %2122 }
 0x323   :  { %2126 = vrcp.f32 %v963_v5  ;;  %v2125_v14 = vpop.eup %2124 }
 0x324   :  { %2128 = vrcp.f32 %v964_v38  ;;  %v965_v63 = vadd.f32 1.0, %v2125_v14 }
 0x326   :  { %2130 = vrcp.f32 %v965_v63 }
 0x32d   :  { %v2127_v1 = vpop.eup %2126 }
 0x32e   :  { %v974_v2 = vmul.f32 %v2127_v1, %v2123_v12  ;;  %v2129_v59 = vpop.eup %2128 }
 0x32f   :  { %v973_v8 = vmul.f32 %v2129_v59, %v2694_v57 }
 0x330   :  { %v2131_v0 = vpop.eup %2130 }
 0x331   :  { %v2740_v58 = vadd.f32 %v974_v2, %v973_v8 }
 0x333   :  { %2132 = vtanh.f32 %v2740_v58 }
 0x33d   :  { %v2133_v20 = vpop.eup %2132 }
 0x33e   :  { %v2743_v61 = vmul.f32 %v2133_v20, %v2131_v0 }
 0x340   :  { %v978_v29 = vpack.c.bf16 %v2743_v61, %v2743_v61 }
 0x342   :  { %1012 = vmatmul.mubr.bf16.vlgmr.msra.gmra.mrb[16].mxu1 %v978_v29  ;;  %1053 = vmatmul.mubr.bf16.vlgmr.msra.gmra.mrb[40].mxu0 %v978_v29  ;;  %v2795_v29 = vld [vmem:[#allocation5] ss:$16 sps:$4 sm:$0xff]  }
 0x343   :  { %1091 = vmatpush1.bf16.msra.mxu1 %v2473_v9  ;;  %1132 = vmatpush1.bf16.msra.mxu0 %v2561_v39  ;;  %v2779_v9 = vld [vmem:[#allocation5 + $0x4] ss:$16 sps:$4 sm:$0xff]  }
 0x344   :  { %1092 = vmatprep.subr.bf16.mxu1 %v2476_v11  ;;  %1133 = vmatprep.subr.bf16.mxu0 %v2564_v41 }
 0x345   :  { %1122 = vmatprep.mubr.bf16.mxu1 %v3119_v16  ;;  %1163 = vmatprep.mubr.bf16.mxu0 %v3119_v16 }
 0x347   :  { %1093 = vmatpush1.bf16.msra.mxu1 %v2480_v13  ;;  %1134 = vmatpush1.bf16.msra.mxu0 %v2567_v42 }
 0x348   :  { %1094 = vmatprep.subr.bf16.mxu1 %v2482_v15  ;;  %1135 = vmatprep.subr.bf16.mxu0 %v2571_v43 }
 0x34b   :  { %1095 = vmatpush1.bf16.msra.mxu1 %v2486_v17  ;;  %1136 = vmatpush1.bf16.msra.mxu0 %v2574_v44 }
 0x34c   :  { %1096 = vmatprep.subr.bf16.mxu1 %v2489_v19  ;;  %1137 = vmatprep.subr.bf16.mxu0 %v2577_v45 }
 0x34f   :  { %1097 = vmatpush1.bf16.msra.mxu1 %v2491_v21  ;;  %1138 = vmatpush1.bf16.msra.mxu0 %v2581_v46 }
 0x350   :  { %1098 = vmatprep.subr.bf16.mxu1 %v2494_v23  ;;  %1139 = vmatprep.subr.bf16.mxu0 %v2585_v47 }
 0x353   :  { %1099 = vmatpush1.bf16.msra.mxu1 %v2497_v25  ;;  %1140 = vmatpush1.bf16.msra.mxu0 %v2588_v48 }
 0x354   :  { %1100 = vmatprep.subr.bf16.mxu1 %v2502_v27  ;;  %1141 = vmatprep.subr.bf16.mxu0 %v2591_v49 }
 0x357   :  { %1101 = vmatpush1.bf16.msra.mxu1 %v2504_v28  ;;  %1142 = vmatpush1.bf16.msra.mxu0 %v2594_v50 }
 0x358   :  { %1102 = vmatprep.subr.bf16.mxu1 %v2508_v31  ;;  %1143 = vmatprep.subr.bf16.mxu0 %v2598_v51 }
 0x35b   :  { %1103 = vmatpush1.bf16.msra.mxu1 %v2510_v32  ;;  %1144 = vmatpush1.bf16.msra.mxu0 %v2601_v52 }
 0x35c   :  { %1104 = vmatprep.subr.bf16.mxu1 %v2514_v35  ;;  %1145 = vmatprep.subr.bf16.mxu0 %v2604_v53 }
 0x35f   :  { %1105 = vmatpush1.bf16.msra.mxu1 %v2516_v36  ;;  %1146 = vmatpush1.bf16.msra.mxu0 %v2608_v54 }
 0x360   :  { %1201 = vmatprep.subr.bf16.mxu1 %v2779_v9  ;;  %1242 = vmatprep.subr.bf16.mxu0 %v2559_v37 }
 0x415   :  { %v1013_v11 = vpop.f32.mrb[16].mxu1  ;;  %v1054_v13 = vpop.f32.mrb[40].mxu0 }
 0x416   :  { %v1061_v15 = vadd.f32 %v1013_v11, %v2639_v18  ;;  %v1063_v17 = vadd.f32 %v1054_v13, %v2667_v3  ;;  %v1015_v19 = vpop.f32.mrb[17].mxu1  ;;  %v1056_v21 = vpop.f32.mrb[41].mxu0  ;;  %v2805_v11 = vld [vmem:[#allocation5 + $0x20] ss:$16 sps:$4 sm:$0xff]   ;;  %v2809_v13 = vld [vmem:[#allocation5 + $0x44] ss:$16 sps:$4 sm:$0xff]  }
 0x417   :  { %v1062_v23 = vadd.f32 %v1015_v19, %v2641_v22  ;;  %v1064_v25 = vadd.f32 %v1056_v21, %v2669_v4  ;;  %v1017_v57 = vpop.f32.mrb[18].mxu1  ;;  %v1058_v33 = vpop.f32.mrb[42].mxu0  ;;  %v2821_v19 = vld [vmem:[#allocation5 + $0x60] ss:$16 sps:$4 sm:$0xff]   ;;  %v2825_v21 = vld [vmem:[#allocation5 + $0x84] ss:$16 sps:$4 sm:$0xff]  }
 0x418   :  { %v1908_v40 = vmul.f32 -1.442695, %v1061_v15  ;;  %v1018_v60 = vpop.f32.mrb[19].mxu1  ;;  %v1059_v6 = vpop.f32.mrb[43].mxu0  ;;  %v1910_v56 = vmul.f32 -1.442695, %v1063_v17 }
 0x419   :  { %v1909_v34 = vmul.f32 -1.442695, %v1062_v23  ;;  %v2813_v15 = vld [vmem:[#allocation5 + $0x40] ss:$16 sps:$4 sm:$0xff]   ;;  %v2817_v17 = vld [vmem:[#allocation5 + $0x64] ss:$16 sps:$4 sm:$0xff]  }
 0x41a   :  { %2134 = vpow2.f32 %v1908_v40  ;;  %v2829_v23 = vld [vmem:[#allocation5 + $0x80] ss:$16 sps:$4 sm:$0xff]  }
 0x41b   :  { %2136 = vpow2.f32 %v1909_v34  ;;  %v3120_v33 = vld [vmem:[#allocation22_spill] sm:$0xff] }
 0x41c   :  { %2138 = vtanh.f32 %v1064_v25 }
 0x41d   :  { %2140 = vpow2.f32 %v1910_v56 }
 0x424   :  { %v2135_v5 = vpop.eup %2134 }
 0x425   :  { %v1074_v7 = vadd.f32 1.0, %v2135_v5  ;;  %v2137_v18 = vpop.eup %2136 }
 0x426   :  { %v1075_v3 = vadd.f32 1.0, %v2137_v18  ;;  %v2139_v22 = vpop.eup %2138 }
 0x427   :  { %2142 = vrcp.f32 %v1074_v7  ;;  %v2141_v38 = vpop.eup %2140 }
 0x428   :  { %2144 = vrcp.f32 %v1075_v3  ;;  %v1076_v1 = vadd.f32 1.0, %v2141_v38 }
 0x42a   :  { %2146 = vrcp.f32 %v1076_v1 }
 0x431   :  { %v2143_v4 = vpop.eup %2142 }
 0x432   :  { %v1085_v12 = vmul.f32 %v2143_v4, %v2139_v22  ;;  %v2145_v14 = vpop.eup %2144 }
 0x433   :  { %v1084_v2 = vmul.f32 %v2145_v14, %v2740_v58  ;;  %v2799_v58 = vld [vmem:[#allocation5 + $0x24] ss:$16 sps:$4 sm:$0xff]  }
 0x434   :  { %v2147_v63 = vpop.eup %2146 }
 0x435   :  { %v2788_v59 = vadd.f32 %v1085_v12, %v1084_v2 }
 0x437   :  { %2148 = vtanh.f32 %v2788_v59 }
 0x441   :  { %v2149_v8 = vpop.eup %2148 }
 0x442   :  { %v2791_v0 = vmul.f32 %v2149_v8, %v2147_v63 }
 0x444   :  { %v1089_v20 = vpack.c.bf16 %v2791_v0, %v2791_v0 }
 0x446   :  { %1123 = vmatmul.mubr.bf16.vlgmr.msra.gmra.mrb[20].mxu1 %v1089_v20  ;;  %1164 = vmatmul.mubr.bf16.vlgmr.msra.gmra.mrb[44].mxu0 %v1089_v20 }
 0x447   :  { %1202 = vmatpush1.bf16.msra.mxu1 %v2795_v29  ;;  %1243 = vmatpush1.bf16.msra.mxu0 %v2561_v39 }
 0x448   :  { %1203 = vmatprep.subr.bf16.mxu1 %v2799_v58  ;;  %1244 = vmatprep.subr.bf16.mxu0 %v2564_v41 }
 0x449   :  { %1233 = vmatprep.mubr.bf16.mxu1 %v3119_v16  ;;  %1274 = vmatprep.mubr.bf16.mxu0 %v3119_v16 }
 0x44b   :  { %1204 = vmatpush1.bf16.msra.mxu1 %v2805_v11  ;;  %1245 = vmatpush1.bf16.msra.mxu0 %v2567_v42 }
 0x44c   :  { %1205 = vmatprep.subr.bf16.mxu1 %v2809_v13  ;;  %1246 = vmatprep.subr.bf16.mxu0 %v2571_v43 }
 0x44f   :  { %1206 = vmatpush1.bf16.msra.mxu1 %v2813_v15  ;;  %1247 = vmatpush1.bf16.msra.mxu0 %v2574_v44 }
 0x450   :  { %1207 = vmatprep.subr.bf16.mxu1 %v2817_v17  ;;  %1248 = vmatprep.subr.bf16.mxu0 %v2577_v45 }
 0x453   :  { %1208 = vmatpush1.bf16.msra.mxu1 %v2821_v19  ;;  %1249 = vmatpush1.bf16.msra.mxu0 %v2581_v46 }
 0x454   :  { %1209 = vmatprep.subr.bf16.mxu1 %v2825_v21  ;;  %1250 = vmatprep.subr.bf16.mxu0 %v2585_v47 }
 0x457   :  { %1210 = vmatpush1.bf16.msra.mxu1 %v2829_v23  ;;  %1251 = vmatpush1.bf16.msra.mxu0 %v2588_v48 }
 0x458   :  { %1211 = vmatprep.subr.bf16.mxu1 %v2502_v27  ;;  %1252 = vmatprep.subr.bf16.mxu0 %v2591_v49 }
 0x45b   :  { %1212 = vmatpush1.bf16.msra.mxu1 %v2504_v28  ;;  %1253 = vmatpush1.bf16.msra.mxu0 %v2594_v50 }
 0x45c   :  { %1213 = vmatprep.subr.bf16.mxu1 %v2508_v31  ;;  %1254 = vmatprep.subr.bf16.mxu0 %v2598_v51 }
 0x45f   :  { %1214 = vmatpush1.bf16.msra.mxu1 %v2510_v32  ;;  %1255 = vmatpush1.bf16.msra.mxu0 %v2601_v52 }
 0x460   :  { %1215 = vmatprep.subr.bf16.mxu1 %v2514_v35  ;;  %1256 = vmatprep.subr.bf16.mxu0 %v2604_v53 }
 0x463   :  { %1216 = vmatpush1.bf16.msra.mxu1 %v2516_v36  ;;  %1257 = vmatpush1.bf16.msra.mxu0 %v2608_v54 }
 0x464   :  { %1312 = vmatprep.subr.bf16.mxu1 %v2779_v9  ;;  %1353 = vmatprep.subr.bf16.mxu0 %v2559_v37 }
 0x519   :  { %v1124_v27 = vpop.f32.mrb[20].mxu1  ;;  %v1165_v28 = vpop.f32.mrb[44].mxu0 }
 0x51a   :  { %v1172_v31 = vadd.f32 %v1124_v27, %v2643_v26  ;;  %v1174_v32 = vadd.f32 %v1165_v28, %v2671_v10  ;;  %v1126_v25 = vpop.f32.mrb[21].mxu1  ;;  %v1167_v57 = vpop.f32.mrb[45].mxu0  ;;  %v2883_v28 = vld [vmem:[#allocation5 + $0xa0] ss:$16 sps:$4 sm:$0xff]  }
 0x51b   :  { %v1173_v35 = vadd.f32 %v1126_v25, %v2645_v30  ;;  %v1175_v40 = vadd.f32 %v1167_v57, %v3120_v33  ;;  %v1128_v60 = vpop.f32.mrb[22].mxu1  ;;  %v1169_v36 = vpop.f32.mrb[46].mxu0  ;;  %v2895_v25 = vld [vmem:[#allocation5 + $0xe4] ss:$16 sps:$4 sm:$0xff]   ;;  %v2899_v57 = vld [vmem:[#allocation5 + $0xe0] ss:$16 sps:$4 sm:$0xff]  }
 0x51c   :  { %v1911_v6 = vmul.f32 -1.442695, %v1172_v31  ;;  %v1129_v34 = vpop.f32.mrb[23].mxu1  ;;  %v1170_v56 = vpop.f32.mrb[47].mxu0  ;;  %v1913_v7 = vmul.f32 -1.442695, %v1174_v32 }
 0x51d   :  { %v1912_v5 = vmul.f32 -1.442695, %v1173_v35  ;;  %v2887_v31 = vld [vmem:[#allocation5 + $0xc4] ss:$16 sps:$4 sm:$0xff]   ;;  %v2891_v32 = vld [vmem:[#allocation5 + $0xc0] ss:$16 sps:$4 sm:$0xff]  }
 0x51e   :  { %2150 = vpow2.f32 %v1911_v6  ;;  %v3122_v36 = vld [vmem:[#allocation23_spill] sm:$0xff] }
 0x51f   :  { %2152 = vpow2.f32 %v1912_v5  ;;  %v3123_v5 = vld [vmem:[#allocation15_spill] sm:$0xff] }
 0x520   :  { %2154 = vtanh.f32 %v1175_v40  ;;  %v3121_v40 = vld [vmem:[#allocation14_spill] sm:$0xff] }
 0x521   :  { %2156 = vpow2.f32 %v1913_v7 }
 0x528   :  { %v2151_v18 = vpop.eup %2150 }
 0x529   :  { %v1185_v3 = vadd.f32 1.0, %v2151_v18  ;;  %v2153_v26 = vpop.eup %2152  ;;  %v3124_v18 = vld [vmem:[#allocation24_spill] sm:$0xff] }
 0x52a   :  { %v1186_v10 = vadd.f32 1.0, %v2153_v26  ;;  %v2155_v30 = vpop.eup %2154 }
 0x52b   :  { %2158 = vrcp.f32 %v1185_v3  ;;  %v2157_v22 = vpop.eup %2156 }
 0x52c   :  { %2160 = vrcp.f32 %v1186_v10  ;;  %v1187_v14 = vadd.f32 1.0, %v2157_v22 }
 0x52e   :  { %2162 = vrcp.f32 %v1187_v14 }
 0x535   :  { %v2159_v38 = vpop.eup %2158 }
 0x536   :  { %v1196_v4 = vmul.f32 %v2159_v38, %v2155_v30  ;;  %v2161_v12 = vpop.eup %2160 }
 0x537   :  { %v1195_v1 = vmul.f32 %v2161_v12, %v2788_v59  ;;  %v2879_v59 = vld [vmem:[#allocation5 + $0xa4] ss:$16 sps:$4 sm:$0xff]  }
 0x538   :  { %v2163_v63 = vpop.eup %2162 }
 0x539   :  { %v2852_v2 = vadd.f32 %v1196_v4, %v1195_v1 }
 0x53b   :  { %2164 = vtanh.f32 %v2852_v2 }
 0x545   :  { %v2165_v8 = vpop.eup %2164 }
 0x546   :  { %v2855_v20 = vmul.f32 %v2165_v8, %v2163_v63 }
 0x548   :  { %v1200_v27 = vpack.c.bf16 %v2855_v20, %v2855_v20 }
 0x54a   :  { %1234 = vmatmul.mubr.bf16.vlgmr.msra.gmra.mrb[24].mxu1 %v1200_v27  ;;  %1275 = vmatmul.mubr.bf16.vlgmr.msra.gmra.mrb[48].mxu0 %v1200_v27 }
 0x54b   :  { %1313 = vmatpush1.bf16.msra.mxu1 %v2795_v29  ;;  %1354 = vmatpush1.bf16.msra.mxu0 %v2561_v39 }
 0x54c   :  { %1314 = vmatprep.subr.bf16.mxu1 %v2799_v58  ;;  %1355 = vmatprep.subr.bf16.mxu0 %v2564_v41 }
 0x54d   :  { %1344 = vmatprep.mubr.bf16.mxu1 %v3119_v16  ;;  %1385 = vmatprep.mubr.bf16.mxu0 %v3119_v16 }
 0x54f   :  { %1315 = vmatpush1.bf16.msra.mxu1 %v2805_v11  ;;  %1356 = vmatpush1.bf16.msra.mxu0 %v2567_v42 }
 0x550   :  { %1316 = vmatprep.subr.bf16.mxu1 %v2809_v13  ;;  %1357 = vmatprep.subr.bf16.mxu0 %v2571_v43 }
 0x553   :  { %1317 = vmatpush1.bf16.msra.mxu1 %v2813_v15  ;;  %1358 = vmatpush1.bf16.msra.mxu0 %v2574_v44 }
 0x554   :  { %1318 = vmatprep.subr.bf16.mxu1 %v2817_v17  ;;  %1359 = vmatprep.subr.bf16.mxu0 %v2577_v45 }
 0x557   :  { %1319 = vmatpush1.bf16.msra.mxu1 %v2821_v19  ;;  %1360 = vmatpush1.bf16.msra.mxu0 %v2581_v46 }
 0x558   :  { %1320 = vmatprep.subr.bf16.mxu1 %v2825_v21  ;;  %1361 = vmatprep.subr.bf16.mxu0 %v2585_v47 }
 0x55b   :  { %1321 = vmatpush1.bf16.msra.mxu1 %v2829_v23  ;;  %1362 = vmatpush1.bf16.msra.mxu0 %v2588_v48 }
 0x55c   :  { %1322 = vmatprep.subr.bf16.mxu1 %v2879_v59  ;;  %1363 = vmatprep.subr.bf16.mxu0 %v2591_v49 }
 0x55f   :  { %1323 = vmatpush1.bf16.msra.mxu1 %v2883_v28  ;;  %1364 = vmatpush1.bf16.msra.mxu0 %v2594_v50 }
 0x560   :  { %1324 = vmatprep.subr.bf16.mxu1 %v2887_v31  ;;  %1365 = vmatprep.subr.bf16.mxu0 %v2598_v51 }
 0x563   :  { %1325 = vmatpush1.bf16.msra.mxu1 %v2891_v32  ;;  %1366 = vmatpush1.bf16.msra.mxu0 %v2601_v52 }
 0x564   :  { %1326 = vmatprep.subr.bf16.mxu1 %v2895_v25  ;;  %1367 = vmatprep.subr.bf16.mxu0 %v2604_v53 }
 0x567   :  { %1327 = vmatpush1.bf16.msra.mxu1 %v2899_v57  ;;  %1368 = vmatpush1.bf16.msra.mxu0 %v2608_v54 }
 0x568   :  { %1423 = vmatprep.subr.bf16.mxu1 %v2779_v9  ;;  %1464 = vmatprep.subr.bf16.mxu0 %v2559_v37 }
 0x61d   :  { %v1235_v35 = vpop.f32.mrb[24].mxu1  ;;  %v1276_v33 = vpop.f32.mrb[48].mxu0 }
 0x61e   :  { %v1283_v60 = vadd.f32 %v1235_v35, %v3121_v40  ;;  %v1285_v6 = vadd.f32 %v1276_v33, %v3122_v36  ;;  %v1237_v34 = vpop.f32.mrb[25].mxu1  ;;  %v1278_v56 = vpop.f32.mrb[49].mxu0 }
 0x61f   :  { %v1284_v7 = vadd.f32 %v1237_v34, %v3123_v5  ;;  %v1286_v3 = vadd.f32 %v1278_v56, %v3124_v18  ;;  %v1239_v26 = vpop.f32.mrb[26].mxu1  ;;  %v1280_v10 = vpop.f32.mrb[50].mxu0 }
 0x620   :  { %v1914_v30 = vmul.f32 -1.442695, %v1283_v60  ;;  %v1240_v22 = vpop.f32.mrb[27].mxu1  ;;  %v1281_v38 = vpop.f32.mrb[51].mxu0  ;;  %v1916_v12 = vmul.f32 -1.442695, %v1285_v6 }
 0x621   :  { %v1915_v4 = vmul.f32 -1.442695, %v1284_v7 }
 0x622   :  { %2166 = vpow2.f32 %v1914_v30 }
 0x623   :  { %2168 = vpow2.f32 %v1915_v4 }
 0x624   :  { %2170 = vtanh.f32 %v1286_v3 }
 0x625   :  { %2172 = vpow2.f32 %v1916_v12 }
 0x62c   :  { %v2167_v14 = vpop.eup %2166 }
 0x62d   :  { %v1296_v1 = vadd.f32 1.0, %v2167_v14  ;;  %v2169_v63 = vpop.eup %2168 }
 0x62e   :  { %v1297_v8 = vadd.f32 1.0, %v2169_v63  ;;  %v2171_v27 = vpop.eup %2170 }
 0x62f   :  { %2174 = vrcp.f32 %v1296_v1  ;;  %v2173_v35 = vpop.eup %2172 }
 0x630   :  { %2176 = vrcp.f32 %v1297_v8  ;;  %v1298_v60 = vadd.f32 1.0, %v2173_v35 }
 0x632   :  { %2178 = vrcp.f32 %v1298_v60  ;;  %v2246_v60 = vld [vmem:[#allocation5 + $0x8] ss:$16 sps:$4 sm:$0xff]  }
 0x639   :  { %v2175_v33 = vpop.eup %2174 }
 0x63a   :  { %v1307_v40 = vmul.f32 %v2175_v33, %v2171_v27  ;;  %v2177_v36 = vpop.eup %2176 }
 0x63b   :  { %v1306_v34 = vmul.f32 %v2177_v36, %v2852_v2 }
 0x63c   :  { %v2179_v6 = vpop.eup %2178 }
 0x63d   :  { %v2910_v56 = vadd.f32 %v1307_v40, %v1306_v34  ;;  %v2247_v34 = vld [vmem:[#allocation5 + $0x2c] ss:$16 sps:$4 sm:$0xff]  }
 0x63f   :  { %2180 = vtanh.f32 %v2910_v56 }
 0x649   :  { %v2181_v5 = vpop.eup %2180 }
 0x64a   :  { %v2913_v7 = vmul.f32 %v2181_v5, %v2179_v6  ;;  %v2249_v6 = vld [vmem:[#allocation5 + $0x4c] ss:$16 sps:$4 sm:$0xff]   ;;  %v2252_v5 = vld [vmem:[#allocation5 + $0x68] ss:$16 sps:$4 sm:$0xff]  }
 0x64c   :  { %v1311_v18 = vpack.c.bf16 %v2913_v7, %v2913_v7 }
 0x64e   :  { %1345 = vmatmul.mubr.bf16.vlgmr.msra.gmra.mrb[28].mxu1 %v1311_v18  ;;  %1386 = vmatmul.mubr.bf16.vlgmr.msra.gmra.mrb[52].mxu0 %v1311_v18  ;;  %v3129_v18 = vld [vmem:[#allocation18_spill] sm:$0xff] }
 0x64f   :  { %1424 = vmatpush1.bf16.msra.mxu1 %v2795_v29  ;;  %1465 = vmatpush1.bf16.msra.mxu0 %v2561_v39 }
 0x650   :  { %1425 = vmatprep.subr.bf16.mxu1 %v2799_v58  ;;  %1466 = vmatprep.subr.bf16.mxu0 %v2564_v41 }
 0x651   :  { %1455 = vmatprep.mubr.bf16.mxu1 %v3119_v16  ;;  %1496 = vmatprep.mubr.bf16.mxu0 %v3119_v16 }
 0x653   :  { %1426 = vmatpush1.bf16.msra.mxu1 %v2805_v11  ;;  %1467 = vmatpush1.bf16.msra.mxu0 %v2567_v42  ;;  %v3125_v42 = vld [vmem:[#allocation16_spill] sm:$0xff] }
 0x654   :  { %1427 = vmatprep.subr.bf16.mxu1 %v2809_v13  ;;  %1468 = vmatprep.subr.bf16.mxu0 %v2571_v43 }
 0x657   :  { %1428 = vmatpush1.bf16.msra.mxu1 %v2813_v15  ;;  %1469 = vmatpush1.bf16.msra.mxu0 %v2574_v44  ;;  %v3126_v44 = vld [vmem:[#allocation25_spill] sm:$0xff] }
 0x658   :  { %1429 = vmatprep.subr.bf16.mxu1 %v2817_v17  ;;  %1470 = vmatprep.subr.bf16.mxu0 %v2577_v45 }
 0x65b   :  { %1430 = vmatpush1.bf16.msra.mxu1 %v2821_v19  ;;  %1471 = vmatpush1.bf16.msra.mxu0 %v2581_v46 }
 0x65c   :  { %1431 = vmatprep.subr.bf16.mxu1 %v2825_v21  ;;  %1472 = vmatprep.subr.bf16.mxu0 %v2585_v47 }
 0x65f   :  { %1432 = vmatpush1.bf16.msra.mxu1 %v2829_v23  ;;  %1473 = vmatpush1.bf16.msra.mxu0 %v2588_v48  ;;  %v3127_v48 = vld [vmem:[#allocation17_spill] sm:$0xff] }
 0x660   :  { %1433 = vmatprep.subr.bf16.mxu1 %v2879_v59  ;;  %1474 = vmatprep.subr.bf16.mxu0 %v2591_v49 }
 0x663   :  { %1434 = vmatpush1.bf16.msra.mxu1 %v2883_v28  ;;  %1475 = vmatpush1.bf16.msra.mxu0 %v2594_v50  ;;  %v3128_v50 = vld [vmem:[#allocation26_spill] sm:$0xff] }
 0x664   :  { %1435 = vmatprep.subr.bf16.mxu1 %v2887_v31  ;;  %1476 = vmatprep.subr.bf16.mxu0 %v2598_v51 }
 0x667   :  { %1436 = vmatpush1.bf16.msra.mxu1 %v2891_v32  ;;  %1477 = vmatpush1.bf16.msra.mxu0 %v2601_v52 }
 0x668   :  { %1437 = vmatprep.subr.bf16.mxu1 %v2895_v25  ;;  %1478 = vmatprep.subr.bf16.mxu0 %v2604_v53 }
 0x66b   :  { %1438 = vmatpush1.bf16.msra.mxu1 %v2899_v57  ;;  %1479 = vmatpush1.bf16.msra.mxu0 %v2608_v54 }
 0x66c   :  { %1534 = vmatprep.subr.bf16.mxu1 %v2779_v9  ;;  %1575 = vmatprep.subr.bf16.mxu0 %v2559_v37 }
 0x721   :  { %v1346_v39 = vpop.f32.mrb[28].mxu1  ;;  %v1387_v41 = vpop.f32.mrb[52].mxu0 }
 0x722   :  { %v1394_v43 = vadd.f32 %v1346_v39, %v3125_v42  ;;  %v1396_v45 = vadd.f32 %v1387_v41, %v3126_v44  ;;  %v1348_v46 = vpop.f32.mrb[29].mxu1  ;;  %v1389_v47 = vpop.f32.mrb[53].mxu0 }
 0x723   :  { %v1395_v49 = vadd.f32 %v1348_v46, %v3127_v48  ;;  %v1397_v51 = vadd.f32 %v1389_v47, %v3128_v50  ;;  %v1350_v52 = vpop.f32.mrb[30].mxu1  ;;  %v1391_v53 = vpop.f32.mrb[54].mxu0 }
 0x724   :  { %v1917_v2 = vmul.f32 -1.442695, %v1394_v43  ;;  %v1351_v54 = vpop.f32.mrb[31].mxu1  ;;  %v1392_v3 = vpop.f32.mrb[55].mxu0  ;;  %v1919_v37 = vmul.f32 -1.442695, %v1396_v45 }
 0x725   :  { %v1918_v9 = vmul.f32 -1.442695, %v1395_v49  ;;  %v3132_v45 = vld [vmem:[#allocation28_spill] sm:$0xff] }
 0x726   :  { %2182 = vpow2.f32 %v1917_v2 }
 0x727   :  { %2184 = vpow2.f32 %v1918_v9 }
 0x728   :  { %2186 = vtanh.f32 %v1397_v51 }
 0x729   :  { %2188 = vpow2.f32 %v1919_v37 }
 0x730   :  { %v2183_v26 = vpop.eup %2182 }
 0x731   :  { %v1407_v10 = vadd.f32 1.0, %v2183_v26  ;;  %v2185_v30 = vpop.eup %2184 }
 0x732   :  { %v1408_v22 = vadd.f32 1.0, %v2185_v30  ;;  %v2187_v38 = vpop.eup %2186 }
 0x733   :  { %2190 = vrcp.f32 %v1407_v10  ;;  %v2189_v4 = vpop.eup %2188 }
 0x734   :  { %2192 = vrcp.f32 %v1408_v22  ;;  %v1409_v63 = vadd.f32 1.0, %v2189_v4 }
 0x736   :  { %2194 = vrcp.f32 %v1409_v63 }
 0x73d   :  { %v2191_v12 = vpop.eup %2190 }
 0x73e   :  { %v1418_v14 = vmul.f32 %v2191_v12, %v2187_v38  ;;  %v2193_v1 = vpop.eup %2192 }
 0x73f   :  { %v1417_v8 = vmul.f32 %v2193_v1, %v2910_v56  ;;  %v2248_v56 = vld [vmem:[#allocation5 + $0x28] ss:$16 sps:$4 sm:$0xff]  }
 0x740   :  { %v2195_v35 = vpop.eup %2194 }
 0x741   :  { %v2956_v27 = vadd.f32 %v1418_v14, %v1417_v8  ;;  %v2095_v8 = vld [vmem:[%s3095_s6 + $0x8] sm:$0xff]  }
 0x743   :  { %2196 = vtanh.f32 %v2956_v27 }
 0x74d   :  { %v2197_v33 = vpop.eup %2196 }
 0x74e   :  { %v2959_v40 = vmul.f32 %v2197_v33, %v2195_v35  ;;  %v1644_v35 = vpack.c.bf16 %v2743_v61, %v2697_v55  ;;  %v2097_v33 = vld [vmem:[%s3095_s6 + $0x18] sm:$0xff]   ;;  %v2098_v55 = vld [vmem:[%s3095_s6 + $0x20] sm:$0xff]   ;;  %v2099_v61 = vld [vmem:[%s3095_s6 + $0x28] sm:$0xff]  }
 0x750   :  { %v1422_v36 = vpack.c.bf16 %v2959_v40, %v2959_v40 }
 0x752   :  { %1456 = vmatmul.mubr.bf16.vlgmr.msra.gmra.mrb[32].mxu1 %v1422_v36  ;;  %1497 = vmatmul.mubr.bf16.vlgmr.msra.gmra.mrb[56].mxu0 %v1422_v36  ;;  %v2100_v36 = vld [vmem:[%s3095_s6 + $0x30] sm:$0xff]  }
 0x753   :  { %1535 = vmatpush1.bf16.msra.mxu1 %v2795_v29  ;;  %1576 = vmatpush1.bf16.msra.mxu0 %v2246_v60  ;;  %v2250_v29 = vld [vmem:[#allocation5 + $0x48] ss:$16 sps:$4 sm:$0xff]  }
 0x754   :  { %1536 = vmatprep.subr.bf16.mxu1 %v2799_v58  ;;  %1577 = vmatprep.subr.bf16.mxu0 %v2247_v34  ;;  %v2251_v58 = vld [vmem:[#allocation5 + $0x6c] ss:$16 sps:$4 sm:$0xff]   ;;  %v1645_v34 = vpack.c.bf16 %v2855_v20, %v2791_v0 }
 0x755   :  { %1566 = vmatprep.mubr.bf16.mxu1 %v3119_v16  ;;  %1607 = vmatprep.mubr.bf16.mxu0 %v3119_v16  ;;  %v2253_v16 = vld [vmem:[#allocation5 + $0x8c] ss:$16 sps:$4 sm:$0xff]  }
 0x756   :  { %v2101_v60 = vld [vmem:[%s3095_s6 + $0x38] sm:$0xff]  }
 0x757   :  { %1537 = vmatpush1.bf16.msra.mxu1 %v2805_v11  ;;  %1578 = vmatpush1.bf16.msra.mxu0 %v2248_v56  ;;  %v2254_v11 = vld [vmem:[#allocation5 + $0x88] ss:$16 sps:$4 sm:$0xff]   ;;  %v1646_v56 = vpack.c.bf16 %v2959_v40, %v2913_v7 }
 0x758   :  { %1538 = vmatprep.subr.bf16.mxu1 %v2809_v13  ;;  %1579 = vmatprep.subr.bf16.mxu0 %v2249_v6  ;;  %v2255_v13 = vld [vmem:[#allocation5 + $0xac] ss:$16 sps:$4 sm:$0xff]  }
 0x75b   :  { %1539 = vmatpush1.bf16.msra.mxu1 %v2813_v15  ;;  %1580 = vmatpush1.bf16.msra.mxu0 %v2250_v29  ;;  %v2256_v15 = vld [vmem:[#allocation5 + $0xa8] ss:$16 sps:$4 sm:$0xff]  }
 0x75c   :  { %1540 = vmatprep.subr.bf16.mxu1 %v2817_v17  ;;  %1581 = vmatprep.subr.bf16.mxu0 %v2251_v58  ;;  %v2257_v17 = vld [vmem:[#allocation5 + $0xcc] ss:$16 sps:$4 sm:$0xff]   ;;  %v3133_v58 = vld [vmem:[#allocation20_spill] sm:$0xff] }
 0x75f   :  { %1541 = vmatpush1.bf16.msra.mxu1 %v2821_v19  ;;  %1582 = vmatpush1.bf16.msra.mxu0 %v2252_v5  ;;  %v2258_v19 = vld [vmem:[#allocation5 + $0xc8] ss:$16 sps:$4 sm:$0xff]  }
 0x760   :  { %1542 = vmatprep.subr.bf16.mxu1 %v2825_v21  ;;  %1583 = vmatprep.subr.bf16.mxu0 %v2253_v16  ;;  %v2259_v21 = vld [vmem:[#allocation5 + $0xec] ss:$16 sps:$4 sm:$0xff]  }
 0x763   :  { %1543 = vmatpush1.bf16.msra.mxu1 %v2829_v23  ;;  %1584 = vmatpush1.bf16.msra.mxu0 %v2254_v11  ;;  %v2260_v23 = vld [vmem:[#allocation5 + $0xe8] ss:$16 sps:$4 sm:$0xff]  }
 0x764   :  { %1544 = vmatprep.subr.bf16.mxu1 %v2879_v59  ;;  %1585 = vmatprep.subr.bf16.mxu0 %v2255_v13  ;;  %v2094_v59 = vld [vmem:[%s3095_s6] sm:$0xff]  }
 0x767   :  { %1545 = vmatpush1.bf16.msra.mxu1 %v2883_v28  ;;  %1586 = vmatpush1.bf16.msra.mxu0 %v2256_v15  ;;  %v3134_v15 = vld [vmem:[#allocation21_spill] sm:$0xff] }
 0x768   :  { %1546 = vmatprep.subr.bf16.mxu1 %v2887_v31  ;;  %1587 = vmatprep.subr.bf16.mxu0 %v2257_v17 }
 0x76b   :  { %1547 = vmatpush1.bf16.msra.mxu1 %v2891_v32  ;;  %1588 = vmatpush1.bf16.msra.mxu0 %v2258_v19  ;;  %v3130_v32 = vld [vmem:[#allocation27_spill] sm:$0xff] }
 0x76c   :  { %1548 = vmatprep.subr.bf16.mxu1 %v2895_v25  ;;  %1589 = vmatprep.subr.bf16.mxu0 %v2259_v21  ;;  %v3131_v25 = vld [vmem:[#allocation19_spill] sm:$0xff] }
 0x76f   :  { %1549 = vmatpush1.bf16.msra.mxu1 %v2899_v57  ;;  %1590 = vmatpush1.bf16.msra.mxu0 %v2260_v23 }
 0x770   :  { %1962 = vmatprep.subr.bf16.mxu1 %v2094_v59 }
 0x825   :  { %v1457_v28 = vpop.f32.mrb[32].mxu1  ;;  %v1498_v31 = vpop.f32.mrb[56].mxu0 }
 0x826   :  { %v1505_v39 = vadd.f32 %v1457_v28, %v3129_v18  ;;  %v1507_v41 = vadd.f32 %v1498_v31, %v3130_v32  ;;  %v1459_v42 = vpop.f32.mrb[33].mxu1  ;;  %v1500_v43 = vpop.f32.mrb[57].mxu0 }
 0x827   :  { %v1506_v44 = vadd.f32 %v1459_v42, %v3131_v25  ;;  %v1508_v46 = vadd.f32 %v1500_v43, %v3132_v45  ;;  %v1461_v57 = vpop.f32.mrb[34].mxu1  ;;  %v1502_v47 = vpop.f32.mrb[58].mxu0  ;;  %v3029_v25 = vld [vmem:[%s3096_s7] ss:$0 sm:$0xff] }
 0x828   :  { %v1920_v48 = vmul.f32 -1.442695, %v1505_v39  ;;  %v1462_v49 = vpop.f32.mrb[35].mxu1  ;;  %v1503_v50 = vpop.f32.mrb[59].mxu0  ;;  %v1922_v52 = vmul.f32 -1.442695, %v1507_v41 }
 0x829   :  { %v1921_v51 = vmul.f32 -1.442695, %v1506_v44 }
 0x82a   :  { %2198 = vpow2.f32 %v1920_v48 }
 0x82b   :  { %2200 = vpow2.f32 %v1921_v51 }
 0x82c   :  { %2202 = vtanh.f32 %v1508_v46 }
 0x82d   :  { %2204 = vpow2.f32 %v1922_v52 }
 0x834   :  { %v2199_v53 = vpop.eup %2198 }
 0x835   :  { %v1518_v2 = vadd.f32 1.0, %v2199_v53  ;;  %v2201_v54 = vpop.eup %2200 }
 0x836   :  { %v1519_v3 = vadd.f32 1.0, %v2201_v54  ;;  %v2203_v9 = vpop.eup %2202 }
 0x837   :  { %2206 = vrcp.f32 %v1518_v2  ;;  %v2205_v37 = vpop.eup %2204 }
 0x838   :  { %2208 = vrcp.f32 %v1519_v3  ;;  %v1520_v22 = vadd.f32 1.0, %v2205_v37 }
 0x83a   :  { %2210 = vrcp.f32 %v1520_v22 }
 0x841   :  { %v2207_v26 = vpop.eup %2206 }
 0x842   :  { %v1529_v10 = vmul.f32 %v2207_v26, %v2203_v9  ;;  %v2209_v30 = vpop.eup %2208 }
 0x843   :  { %v1528_v38 = vmul.f32 %v2209_v30, %v2956_v27  ;;  %v2096_v27 = vld [vmem:[%s3095_s6 + $0x10] sm:$0xff]  }
 0x844   :  { %v2211_v12 = vpop.eup %2210 }
 0x845   :  { %v2988_v4 = vadd.f32 %v1529_v10, %v1528_v38 }
 0x847   :  { %2212 = vtanh.f32 %v2988_v4 }
 0x851   :  { %v2213_v14 = vpop.eup %2212 }
 0x852   :  { %v2991_v1 = vmul.f32 %v2213_v14, %v2211_v12 }
 0x854   :  { %v1533_v63 = vpack.c.bf16 %v2991_v1, %v2991_v1 }
 0x856   :  { %1567 = vmatmul.mubr.bf16.vlgmr.msra.gmra.mrb[36].mxu1 %v1533_v63  ;;  %1608 = vmatmul.mubr.bf16.vlgmr.msra.gmra.mrb[60].mxu0 %v1533_v63 }
 0x857   :  { %1963 = vmatpush3.bf16.msra.mxu1 %v2094_v59  ;;  %1978 = vmatprep.mubr.bf16.mxu1 %v1644_v35 }
 0x858   :  { %1964 = vmatprep.subr.bf16.mxu1 %v2095_v8 }
 0x85b   :  { %1965 = vmatpush3.bf16.msra.mxu1 %v2095_v8 }
 0x85c   :  { %1966 = vmatprep.subr.bf16.mxu1 %v2096_v27 }
 0x85f   :  { %1967 = vmatpush3.bf16.msra.mxu1 %v2096_v27 }
 0x860   :  { %1968 = vmatprep.subr.bf16.mxu1 %v2097_v33 }
 0x863   :  { %1969 = vmatpush3.bf16.msra.mxu1 %v2097_v33 }
 0x864   :  { %1970 = vmatprep.subr.bf16.mxu1 %v2098_v55 }
 0x867   :  { %1971 = vmatpush3.bf16.msra.mxu1 %v2098_v55 }
 0x868   :  { %1972 = vmatprep.subr.bf16.mxu1 %v2099_v61 }
 0x86b   :  { %1973 = vmatpush3.bf16.msra.mxu1 %v2099_v61 }
 0x86c   :  { %1974 = vmatprep.subr.bf16.mxu1 %v2100_v36 }
 0x86f   :  { %1975 = vmatpush3.bf16.msra.mxu1 %v2100_v36 }
 0x870   :  { %1976 = vmatprep.subr.bf16.mxu1 %v2101_v60 }
 0x873   :  { %1977 = vmatpush3.bf16.msra.mxu1 %v2101_v60 }
 0x876   :  { %1979 = vmatmul.mubr.bf16.vlgmr.msra.gmra.mrb[40].mxu1 %v1645_v34 }
 0x877   :  { %1982 = vmatprep.mubr.bf16.mxu1 %v1646_v56 }
 0x929   :  { %v1568_v6 = vpop.f32.mrb[36].mxu1  ;;  %v1609_v29 = vpop.f32.mrb[60].mxu0 }
 0x92a   :  { %v1616_v5 = vadd.f32 %v1568_v6, %v3133_v58  ;;  %v1618_v16 = vadd.f32 %v1609_v29, %v2687_v24  ;;  %v1570_v11 = vpop.f32.mrb[37].mxu1  ;;  %v1611_v13 = vpop.f32.mrb[61].mxu0 }
 0x92b   :  { %v1617_v17 = vadd.f32 %v1570_v11, %v3134_v15  ;;  %v1619_v19 = vadd.f32 %v1611_v13, %v2689_v62  ;;  %v1572_v21 = vpop.f32.mrb[38].mxu1  ;;  %v1613_v23 = vpop.f32.mrb[62].mxu0 }
 0x92c   :  { %v1923_v0 = vmul.f32 -1.442695, %v1616_v5  ;;  %v1573_v20 = vpop.f32.mrb[39].mxu1  ;;  %v1614_v59 = vpop.f32.mrb[63].mxu0  ;;  %v1925_v40 = vmul.f32 -1.442695, %v1618_v16 }
 0x92d   :  { %v1924_v7 = vmul.f32 -1.442695, %v1617_v17 }
 0x92e   :  { %2214 = vpow2.f32 %v1923_v0 }
 0x92f   :  { %2216 = vpow2.f32 %v1924_v7 }
 0x930   :  { %2218 = vtanh.f32 %v1619_v19 }
 0x931   :  { %2220 = vpow2.f32 %v1925_v40 }
 0x938   :  { %v2215_v28 = vpop.eup %2214 }
 0x939   :  { %v1629_v31 = vadd.f32 1.0, %v2215_v28  ;;  %v2217_v18 = vpop.eup %2216 }
 0x93a   :  { %v1630_v24 = vadd.f32 1.0, %v2217_v18  ;;  %v2219_v39 = vpop.eup %2218 }
 0x93b   :  { %2222 = vrcp.f32 %v1629_v31  ;;  %v2221_v32 = vpop.eup %2220 }
 0x93c   :  { %2224 = vrcp.f32 %v1630_v24  ;;  %v1631_v43 = vadd.f32 1.0, %v2221_v32 }
 0x93e   :  { %2226 = vrcp.f32 %v1631_v43 }
 0x945   :  { %v2223_v62 = vpop.eup %2222 }
 0x946   :  { %v1640_v41 = vmul.f32 %v2223_v62, %v2219_v39  ;;  %v2225_v42 = vpop.eup %2224 }
 0x947   :  { %v1639_v44 = vmul.f32 %v2225_v42, %v2988_v4 }
 0x948   :  { %v2227_v53 = vpop.eup %2226 }
 0x949   :  { %v1980_v45 = vpop.f32.mrb[40].mxu1  ;;  %v1641_v46 = vadd.f32 %v1640_v41, %v1639_v44 }
 0x94a   :  { %v1762_v57 = vadd.f32 %v1980_v45, %v3029_v25  ;;  %v1753_v47 = vpop.f32.mrb[41].mxu1 }
 0x94b   :  { %v1754_v48 = vadd.f32 %v3029_v25, %v1753_v47  ;;  %v1981_v49 = vpop.f32.mrb[42].mxu1  ;;  %2228 = vtanh.f32 %v1641_v46  ;;  %1793 = vst [vmem:[#allocation8] sm:$0xff] %v1641_v46 }
 0x94c   :  { %1786 = vst [vmem:[%s3099_s10 + $0x10] sm:$0xff] %v1762_v57  ;;  %v1765_v50 = vadd.f32 %v1981_v49, %v3029_v25  ;;  %v1756_v51 = vpop.f32.mrb[43].mxu1 }
 0x94d   :  { %1784 = vst [vmem:[%s3099_s10] sm:$0xff] %v1754_v48  ;;  %v1757_v52 = vadd.f32 %v3029_v25, %v1756_v51 }
 0x94e   :  { %1787 = vst [vmem:[%s3099_s10 + $0x18] sm:$0xff] %v1765_v50 }
 0x94f   :  { %1785 = vst [vmem:[%s3099_s10 + $0x8] sm:$0xff] %v1757_v52 }
 0x955   :  { %v2229_v2 = vpop.eup %2228 }
 0x956   :  { %v1643_v54 = vmul.f32 %v2229_v2, %v2227_v53 }
 0x958   :  { %v1647_v3 = vpack.c.bf16 %v1643_v54, %v2991_v1  ;;  %1792 = vst [vmem:[#allocation7] sm:$0xff] %v1643_v54 }
 0x95a   :  { %1983 = vmatmul.mubr.bf16.gmra.mrb[44].mxu1 %v1647_v3 }
 0x95b   :  { %2316 = shalt.err (!%p2313_p6)
}
 0x95c   :  { %s2317_s27 = scalar_lea.hbm %s3100_s11, 128 }
 0x95d   :  { %p2318_p7 = scmp.ne.s32.totalorder %s3100_s11, %s2317_s27  ;;  %p2321_p8 = scmp.lt.u32.totalorder %s2317_s27, %s3100_s11 }
 0x95f   :  { %p2323_p9 = pnand %p2321_p8, %p2318_p7 }
 0x961   :  { %2326 = shalt.err (!%p2323_p9)
}
 0x962   :  { %1805 = dma.vmem_to_hbm [thread:$0]  %s1803_s21, 128, %s3100_s11, [#allocation4]  }
 0x963   :  { %s2327_s16 = scalar_lea.vmem %s1813_s23, 128  ;;  %p2332_p11 = scmp.lt.s32.totalorder %s1813_s23, %s1813_s23 }
 0x964   :  { %p2328_p10 = scmp.ne.s32.totalorder %s1813_s23, %s2327_s16  ;;  %p2333_p12 = scmp.lt.s32.totalorder %s2327_s16, %s2327_s16 }
 0x966   :  { %p2334_p13 = por %p2333_p12, %p2332_p11 }
 0x968   :  { %p2335_p0 = pnand %p2334_p13, %p2328_p10 }
 0x96a   :  { %2338 = shalt.err (!%p2335_p0)
}
 0x96b   :  { %s2339_s13 = scalar_lea.hbm %s3101_s12, 128 }
 0x96c   :  { %p2340_p1 = scmp.ne.s32.totalorder %s3101_s12, %s2339_s13  ;;  %p2343_p2 = scmp.lt.u32.totalorder %s2339_s13, %s3101_s12 }
 0x96e   :  { %p2345_p3 = pnand %p2343_p2, %p2340_p1 }
 0x970   :  { %2348 = shalt.err (!%p2345_p3)
}
 0x971   :  { %1815 = dma.vmem_to_hbm [thread:$0]  %s1813_s23, 128, %s3101_s12, [#allocation9]  }
 0xa2d   :  { %v1984_v9 = vpop.f32.mrb[44].mxu1 }
 0xa2e   :  { %v1778_v37 = vadd.f32 %v1984_v9, %v3029_v25  ;;  %v1769_v26 = vpop.f32.mrb[45].mxu1 }
 0xa2f   :  { %v1770_v10 = vadd.f32 %v3029_v25, %v1769_v26  ;;  %v1985_v30 = vpop.f32.mrb[46].mxu1 }
 0xa30   :  { %1790 = vst [vmem:[%s3099_s10 + $0x30] sm:$0xff] %v1778_v37  ;;  %v1781_v22 = vadd.f32 %v1985_v30, %v3029_v25  ;;  %v1772_v38 = vpop.f32.mrb[47].mxu1 }
 0xa31   :  { %1788 = vst [vmem:[%s3099_s10 + $0x20] sm:$0xff] %v1770_v10  ;;  %v1773_v4 = vadd.f32 %v3029_v25, %v1772_v38 }
 0xa32   :  { %1791 = vst [vmem:[%s3099_s10 + $0x38] sm:$0xff] %v1781_v22 }
 0xa33   :  { %1789 = vst [vmem:[%s3099_s10 + $0x28] sm:$0xff] %v1773_v4 }
 0xa34   :  { %2353 = dma.done.wait [#allocation4], 128  }
 0xa35   :  { %2354 = vsyncadd [#allocation4], 4294967168 }
 0xa36   :  { %2355 = dma.done.wait [#allocation9], 128  }
 0xa37   :  { %2356 = vsyncadd [#allocation9], 4294967168 }
 0xa38   :  { %1824 = vsyncpa [#allocation3], 1 }
 0xa39   :  { %1825 = vsyncpa [#allocation6], 1 }
 0xa3a   :  { %1826 = vsyncpa [#allocation4], 1 }
 0xa3b   :  { %1827 = vsyncpa [#allocation9], 1 }

</bundles_post_ra>
